<compile_context>
chip_gen: v6e
topology: v6e:2x2x1
jax: 0.10.0
libtpu: 0.0.40
codegen_flags: <defaults>
</compile_context>

<pallas_src>
import functools

import jax
import jax.numpy as jnp
import numpy as np
from jax.experimental import pallas as pl
from jax.experimental.pallas import tpu as pltpu


def _round_up(x, m):
    return ((x + m - 1) // m) * m


# ----------------------------------------------------------------------------
# Init-time lowering of one conv layer to its per-output-row operator.
#
# In the kernel, for every output row `oh`:
#     out_row[oh] = concat_kh( in_row[oh*stride + kh] ) @ W     (+ bias, ReLU)
# where in_row[h] is the NHWC-flat input row (layout iw*c_in + ci, zero padded
# to `in_row_width` lanes) and out_row is the NHWC-flat output row (layout
# ow*c_out + co, zero padded to `out_row_width` lanes).  Only the W-axis
# sliding window is folded into W (shape k*in_row_width x out_row_width); the
# H-axis window is assembled in-kernel with aligned concats/lane slices.
# VALID padding and the module's fixed strides are assumed.
# ----------------------------------------------------------------------------
def conv_row_operator(w_hwio, w_in, stride, in_row_width, out_row_width):
    k, _, c_in, c_out = w_hwio.shape
    w_out = (w_in - k) // stride + 1
    assert w_out * c_out <= out_row_width
    w_np = np.asarray(w_hwio, np.float32)
    mat = np.zeros((k * in_row_width, out_row_width), np.float32)
    for kh in range(k):
        for ow in range(w_out):
            for kw in range(k):
                iw = ow * stride + kw
                r0 = kh * in_row_width + iw * c_in
                c0 = ow * c_out
                mat[r0:r0 + c_in, c0:c0 + c_out] = w_np[kh, kw]
    return mat


def conv_row_bias(b, w_out, out_row_width):
    b_np = np.asarray(b, np.float32)
    out = np.zeros((out_row_width,), np.float32)
    out[: w_out * b_np.shape[0]] = np.tile(b_np, w_out)
    return out


# ----------------------------------------------------------------------------
# Fused kernel: in-kernel row-im2col + 6 matmuls, all in VMEM/vregs.
# ----------------------------------------------------------------------------
def make_dqn_kernel(d):
    h1, h2 = d["h1"], d["h2"]
    k1, k2, k3, s2 = d["k1"], d["k2"], d["k3"], d["s2"]
    rw0, rw1, rw2 = d["rw0"], d["rw1"], d["rw2"]
    assert h2 == k3  # conv3 spatial output is 1x1 -> it consumes all h2 rows

    def kernel(x_ref,
               w1_ref, b1_ref, w2_ref, b2_ref, w3_ref, b3_ref,
               w4_ref, b4_ref, w5_ref, b5_ref, w6_ref, b6_ref,
               o_ref):
        bm = x_ref.shape[0]
        bf16, f32 = jnp.bfloat16, jnp.float32

        def bias_relu(z, b_ref):                       # f32 epilogue, bf16 out
            return jnp.maximum(z + b_ref[...], 0.0).astype(bf16)

        # conv1: the k1-row window for output row `oh` is a contiguous lane
        # slice of the NHWC-flat image (row stride = rw0 lanes).  Input is
        # loaded f32 and cast to bf16 here (no wrapper-side cast op).
        im1 = jnp.concatenate(
            [x_ref[:, oh * rw0: oh * rw0 + k1 * rw0].astype(bf16)
             for oh in range(h1)], axis=0)                        # (h1*bm, k1*rw0)
        r1 = bias_relu(jnp.dot(im1, w1_ref[...], preferred_element_type=f32),
                       b1_ref)                                    # (h1*bm, rw1)
        rows1 = [r1[ih * bm:(ih + 1) * bm, :] for ih in range(h1)]

        # conv2 (stride s2): lane-aligned concat of k2 conv1 rows per out row.
        im2 = jnp.concatenate(
            [jnp.concatenate([rows1[s2 * oh + kh] for kh in range(k2)], axis=1)
             for oh in range(h2)], axis=0)                        # (h2*bm, k2*rw1)
        r2 = bias_relu(jnp.dot(im2, w2_ref[...], preferred_element_type=f32),
                       b2_ref)                                    # (h2*bm, rw2)
        rows2 = [r2[ih * bm:(ih + 1) * bm, :] for ih in range(h2)]

        # conv3: 1x1 spatial output -> one aligned concat of all rows.
        im3 = jnp.concatenate(rows2, axis=1)                      # (bm, k3*rw2)
        h = bias_relu(jnp.dot(im3, w3_ref[...], preferred_element_type=f32),
                      b3_ref)                                     # (bm, 128)

        # fc stack (all K/N lane-aligned; zero pad rows/cols are inert).
        h = bias_relu(jnp.dot(h, w4_ref[...], preferred_element_type=f32), b4_ref)
        h = bias_relu(jnp.dot(h, w5_ref[...], preferred_element_type=f32), b5_ref)
        q = jnp.dot(h, w6_ref[...], preferred_element_type=f32) + b6_ref[...]
        o_ref[...] = q.astype(o_ref.dtype)                        # unmasked 128-lane store

    return kernel


def _block_m_cap():
    # 256-row MXU on v6e / v7x -> bigger M tile; v5e's MXU is 128-wide.
    try:
        kind = jax.devices()[0].device_kind.lower()
    except Exception:
        return 128
    return 256 if ("v6" in kind or "v7" in kind) else 128


def conv_dq_forward(obs_nhwc, params, dims, output_dim):
    n = obs_nhwc.shape[0]
    feat = obs_nhwc.reshape(n, dims["in_feat"])        # free reshape, stays f32
    m8 = _round_up(max(n, 1), 8)
    block_m = min(m8, _block_m_cap())
    m_pad = _round_up(m8, block_m)
    if m_pad != n:
        feat = jnp.pad(feat, ((0, m_pad - n), (0, 0)))

    weights, biases = params["weights"], params["biases"]
    in_specs = [pl.BlockSpec((block_m, dims["in_feat"]), lambda i: (i, 0))]
    args = [feat]
    for w, b in zip(weights, biases):
        # Constant index_map -> weights/biases fetched once and resident
        # across grid steps (~1.6 MiB total, fine even double-buffered).
        in_specs.append(pl.BlockSpec(w.shape, lambda i: (0, 0)))
        in_specs.append(pl.BlockSpec(b.shape, lambda i: (0, 0)))
        args += [w, b]

    out = pl.pallas_call(
        make_dqn_kernel(dims),
        out_shape=jax.ShapeDtypeStruct((m_pad, dims["n_out_pad"]), jnp.float32),
        grid=(m_pad // block_m,),
        in_specs=in_specs,
        out_specs=pl.BlockSpec((block_m, dims["n_out_pad"]), lambda i: (i, 0)),
        compiler_params=pltpu.CompilerParams(
            dimension_semantics=("parallel",),
            vmem_limit_bytes=32 * 1024 * 1024),
    )(*args)
    return out[:n, :output_dim]


# ----------------------------------------------------------------------------
# Synthetic parameters (shapes match ConvDQNetwork), pre-lowered for the kernel.
# ----------------------------------------------------------------------------
def build_params(key, input_dim, output_dim):
    c0, h0, w0 = input_dim
    keys = jax.random.split(key, 12)

    def normal(k, shape, fan_in):
        return jax.random.normal(k, shape, jnp.float32) * np.sqrt(2.0 / fan_in)

    def uniform(k, shape, scale=0.05):
        return jax.random.uniform(k, shape, jnp.float32, -scale, scale)

    raw = {}
    raw["cw1"] = normal(keys[0], (8, 8, c0, 32), 8 * 8 * c0)
    raw["cb1"] = uniform(keys[1], (32,))
    raw["cw2"] = normal(keys[2], (4, 4, 32, 64), 4 * 4 * 32)
    raw["cb2"] = uniform(keys[3], (64,))
    raw["cw3"] = normal(keys[4], (3, 3, 64, 64), 3 * 3 * 64)
    raw["cb3"] = uniform(keys[5], (64,))

    h1, w1o = h0 - 8 + 1, w0 - 8 + 1                   # conv1: k=8 s=1
    h2, w2o = (h1 - 4) // 2 + 1, (w1o - 4) // 2 + 1    # conv2: k=4 s=2
    h3, w3o = h2 - 3 + 1, w2o - 3 + 1                  # conv3: k=3 s=1
    fc_in = 64 * h3 * w3o
    raw["fw1"] = normal(keys[6], (fc_in, 128), fc_in)
    raw["fb1"] = uniform(keys[7], (128,))
    raw["fw2"] = normal(keys[8], (128, 256), 128)
    raw["fb2"] = uniform(keys[9], (256,))
    raw["fw3"] = normal(keys[10], (256, output_dim), 256)
    raw["fb3"] = uniform(keys[11], (output_dim,))

    # TODO(synk): the FC stack reads the conv3 output as a plain channel
    # vector, which equals PyTorch's NCHW .view(N,-1) only because conv3's
    # spatial output is 1x1 for this input_dim; a >1x1 feature map would need
    # an explicit NCHW reordering of the final conv operator's columns.
    assert h3 == 1 and w3o == 1, "kernel assumes a 1x1 conv3 feature map"

    rw0 = w0 * c0                            # flat NHWC input row width (64)
    rw1 = _round_up(w1o * 32, 128)           # conv1 out row width 288 -> 384
    rw2 = _round_up(w2o * 64, 128)           # conv2 out row width 192 -> 256
    rw3 = _round_up(fc_in, 128)              # conv3 out / fc1 K     64 -> 128
    n_out_pad = _round_up(output_dim, 128)   # lane-dense final store

    m1 = conv_row_operator(raw["cw1"], w0, 1, rw0, rw1)
    m2 = conv_row_operator(raw["cw2"], w1o, 2, rw1, rw2)
    m3 = conv_row_operator(raw["cw3"], w2o, 1, rw2, rw3)
    bb1 = conv_row_bias(raw["cb1"], w1o, rw1)
    bb2 = conv_row_bias(raw["cb2"], w2o, rw2)
    bb3 = conv_row_bias(raw["cb3"], w3o, rw3)

    fw1p = np.zeros((rw3, 128), np.float32)
    fw1p[:fc_in, :] = np.asarray(raw["fw1"])
    fw3p = np.zeros((256, n_out_pad), np.float32)
    fw3p[:, :output_dim] = np.asarray(raw["fw3"])
    fb3p = np.zeros((n_out_pad,), np.float32)
    fb3p[:output_dim] = np.asarray(raw["fb3"])

    ws = (m1, m2, m3, fw1p, np.asarray(raw["fw2"]), fw3p)
    bs = (bb1, bb2, bb3, np.asarray(raw["fb1"]), np.asarray(raw["fb2"]), fb3p)
    params = {
        "weights": tuple(jnp.asarray(w, jnp.bfloat16) for w in ws),
        "biases": tuple(jnp.asarray(b, jnp.float32).reshape(1, -1) for b in bs),
    }
    dims = dict(h1=h1, h2=h2, k1=8, k2=4, k3=3, s2=2,
                rw0=rw0, rw1=rw1, rw2=rw2,
                in_feat=h0 * w0 * c0, n_out_pad=n_out_pad)
    return params, dims, raw


# ----------------------------------------------------------------------------
# Pure-JAX f32 reference mirroring ConvDQNetwork.forward (for the self-check).
# ----------------------------------------------------------------------------
def reference_forward(obs_nhwc, raw):
    dn = ("NHWC", "HWIO", "NHWC")
    hp = jax.lax.Precision.HIGHEST
    x = jax.lax.conv_general_dilated(obs_nhwc, raw["cw1"], (1, 1), "VALID",
                                     dimension_numbers=dn, precision=hp)
    x = jax.nn.relu(x + raw["cb1"])
    x = jax.lax.conv_general_dilated(x, raw["cw2"], (2, 2), "VALID",
                                     dimension_numbers=dn, precision=hp)
    x = jax.nn.relu(x + raw["cb2"])
    x = jax.lax.conv_general_dilated(x, raw["cw3"], (1, 1), "VALID",
                                     dimension_numbers=dn, precision=hp)
    x = jax.nn.relu(x + raw["cb3"])
    feats = jnp.transpose(x, (0, 3, 1, 2)).reshape(x.shape[0], -1)   # NCHW flatten
    h = jax.nn.relu(jnp.dot(feats, raw["fw1"], precision=hp) + raw["fb1"])
    h = jax.nn.relu(jnp.dot(h, raw["fw2"], precision=hp) + raw["fb2"])
    return jnp.dot(h, raw["fw3"], precision=hp) + raw["fb3"]


if __name__ == "__main__":
    # input_dim = (C, H, W) = (4, 16, 16); output_dim = 6 actions; batch = 2
    input_dim = (4, 16, 16)
    output_dim = 6
    batch = 2

    key = jax.random.PRNGKey(0)
    k_params, k_obs = jax.random.split(key)
    params, dims, raw = build_params(k_params, input_dim, output_dim)

    # Observations arrive NHWC, exactly like the PyTorch module (whose
    # internal permute to NCHW is folded into the pre-lowered operators).
    obs = jax.random.normal(
        k_obs, (batch, input_dim[1], input_dim[2], input_dim[0]), jnp.float32)

    fwd = jax.jit(lambda o, p: conv_dq_forward(o, p, dims, output_dim))
    qvals = jax.block_until_ready(fwd(obs, params))
    assert qvals.shape == (batch, output_dim), qvals.shape

    # Relative correctness check against the pure-JAX f32 reference
    # (kernel runs bf16 operands with f32 accumulation).
    q_ref = jax.block_until_ready(reference_forward(obs, raw))
    abs_err = float(jnp.max(jnp.abs(qvals - q_ref)))
    scale = float(jnp.max(jnp.abs(q_ref)))
    assert abs_err <= 0.05 * max(scale, 1.0) + 0.02, (
        f"max abs err {abs_err} vs reference scale {scale}")

    print("KERNEL_OK")
</pallas_src>

<mosaic_0001>
module attributes {stable_mosaic.version = 11 : i64} {
  func.func @kernel(%arg0: i32, %arg1: memref<8x1024xf32, #tpu.memory_space<vmem>>, %arg2: memref<512x384xbf16, #tpu.memory_space<vmem>>, %arg3: memref<1x384xf32, #tpu.memory_space<vmem>>, %arg4: memref<1536x256xbf16, #tpu.memory_space<vmem>>, %arg5: memref<1x256xf32, #tpu.memory_space<vmem>>, %arg6: memref<768x128xbf16, #tpu.memory_space<vmem>>, %arg7: memref<1x128xf32, #tpu.memory_space<vmem>>, %arg8: memref<128x128xbf16, #tpu.memory_space<vmem>>, %arg9: memref<1x128xf32, #tpu.memory_space<vmem>>, %arg10: memref<128x256xbf16, #tpu.memory_space<vmem>>, %arg11: memref<1x256xf32, #tpu.memory_space<vmem>>, %arg12: memref<256x128xbf16, #tpu.memory_space<vmem>>, %arg13: memref<1x128xf32, #tpu.memory_space<vmem>>, %arg14: memref<8x128xf32, #tpu.memory_space<vmem>>) attributes {dimension_semantics = [#tpu.dimension_semantics<parallel>], iteration_bounds = array<i64: 1>, scalar_prefetch = 0 : i64, scratch_operands = 0 : i64, tpu.core_type = #tpu.core_type<tc>, window_params = [{transform_indices = @transform_0, window_bounds = array<i64: 8, 1024>}, {pipeline_mode = #tpu.pipeline_mode<synchronous>, transform_indices = @transform_1, window_bounds = array<i64: 512, 384>}, {pipeline_mode = #tpu.pipeline_mode<synchronous>, transform_indices = @transform_2, window_bounds = array<i64: 1, 384>}, {pipeline_mode = #tpu.pipeline_mode<synchronous>, transform_indices = @transform_3, window_bounds = array<i64: 1536, 256>}, {pipeline_mode = #tpu.pipeline_mode<synchronous>, transform_indices = @transform_4, window_bounds = array<i64: 1, 256>}, {pipeline_mode = #tpu.pipeline_mode<synchronous>, transform_indices = @transform_5, window_bounds = array<i64: 768, 128>}, {pipeline_mode = #tpu.pipeline_mode<synchronous>, transform_indices = @transform_6, window_bounds = array<i64: 1, 128>}, {pipeline_mode = #tpu.pipeline_mode<synchronous>, transform_indices = @transform_7, window_bounds = array<i64: 128, 128>}, {pipeline_mode = #tpu.pipeline_mode<synchronous>, transform_indices = @transform_8, window_bounds = array<i64: 1, 128>}, {pipeline_mode = #tpu.pipeline_mode<synchronous>, transform_indices = @transform_9, window_bounds = array<i64: 128, 256>}, {pipeline_mode = #tpu.pipeline_mode<synchronous>, transform_indices = @transform_10, window_bounds = array<i64: 1, 256>}, {pipeline_mode = #tpu.pipeline_mode<synchronous>, transform_indices = @transform_11, window_bounds = array<i64: 256, 128>}, {pipeline_mode = #tpu.pipeline_mode<synchronous>, transform_indices = @transform_12, window_bounds = array<i64: 1, 128>}, {transform_indices = @transform_13, window_bounds = array<i64: 8, 128>}]} {
    %c0 = arith.constant 0 : index
    %c0_0 = arith.constant 0 : index
    %0 = vector.load %arg1[%c0, %c0_0] : memref<8x1024xf32, #tpu.memory_space<vmem>>, vector<8x512xf32>
    %1 = arith.truncf %0 : vector<8x512xf32> to vector<8x512xbf16>
    %c0_1 = arith.constant 0 : index
    %c64 = arith.constant 64 : index
    %2 = vector.load %arg1[%c0_1, %c64] : memref<8x1024xf32, #tpu.memory_space<vmem>>, vector<8x512xf32>
    %3 = arith.truncf %2 : vector<8x512xf32> to vector<8x512xbf16>
    %c0_2 = arith.constant 0 : index
    %c128 = arith.constant 128 : index
    %4 = vector.load %arg1[%c0_2, %c128] : memref<8x1024xf32, #tpu.memory_space<vmem>>, vector<8x512xf32>
    %5 = arith.truncf %4 : vector<8x512xf32> to vector<8x512xbf16>
    %c0_3 = arith.constant 0 : index
    %c192 = arith.constant 192 : index
    %6 = vector.load %arg1[%c0_3, %c192] : memref<8x1024xf32, #tpu.memory_space<vmem>>, vector<8x512xf32>
    %7 = arith.truncf %6 : vector<8x512xf32> to vector<8x512xbf16>
    %c0_4 = arith.constant 0 : index
    %c256 = arith.constant 256 : index
    %8 = vector.load %arg1[%c0_4, %c256] : memref<8x1024xf32, #tpu.memory_space<vmem>>, vector<8x512xf32>
    %9 = arith.truncf %8 : vector<8x512xf32> to vector<8x512xbf16>
    %c0_5 = arith.constant 0 : index
    %c320 = arith.constant 320 : index
    %10 = vector.load %arg1[%c0_5, %c320] : memref<8x1024xf32, #tpu.memory_space<vmem>>, vector<8x512xf32>
    %11 = arith.truncf %10 : vector<8x512xf32> to vector<8x512xbf16>
    %c0_6 = arith.constant 0 : index
    %c384 = arith.constant 384 : index
    %12 = vector.load %arg1[%c0_6, %c384] : memref<8x1024xf32, #tpu.memory_space<vmem>>, vector<8x512xf32>
    %13 = arith.truncf %12 : vector<8x512xf32> to vector<8x512xbf16>
    %c0_7 = arith.constant 0 : index
    %c448 = arith.constant 448 : index
    %14 = vector.load %arg1[%c0_7, %c448] : memref<8x1024xf32, #tpu.memory_space<vmem>>, vector<8x512xf32>
    %15 = arith.truncf %14 : vector<8x512xf32> to vector<8x512xbf16>
    %c0_8 = arith.constant 0 : index
    %c512 = arith.constant 512 : index
    %16 = vector.load %arg1[%c0_8, %c512] : memref<8x1024xf32, #tpu.memory_space<vmem>>, vector<8x512xf32>
    %17 = arith.truncf %16 : vector<8x512xf32> to vector<8x512xbf16>
    %18 = tpu.concatenate %1, %3, %5, %7, %9, %11, %13, %15, %17 in 0 : vector<8x512xbf16>, vector<8x512xbf16>, vector<8x512xbf16>, vector<8x512xbf16>, vector<8x512xbf16>, vector<8x512xbf16>, vector<8x512xbf16>, vector<8x512xbf16>, vector<8x512xbf16> -> vector<72x512xbf16>
    %c0_9 = arith.constant 0 : index
    %c0_10 = arith.constant 0 : index
    %19 = vector.load %arg2[%c0_9, %c0_10] : memref<512x384xbf16, #tpu.memory_space<vmem>>, vector<512x384xbf16>
    %cst = arith.constant dense<0.000000e+00> : vector<72x384xf32>
    %20 = tpu.matmul %18, %19, %cst {dimension_numbers = #tpu.dot_dimension_numbers<[1], [0], [0], [1], [0, 0, 1, 1], [], []>} : vector<72x512xbf16>, vector<512x384xbf16>, vector<72x384xf32> -> vector<72x384xf32>
    %c0_11 = arith.constant 0 : index
    %c0_12 = arith.constant 0 : index
    %21 = vector.load %arg3[%c0_11, %c0_12] : memref<1x384xf32, #tpu.memory_space<vmem>>, vector<1x384xf32>
    %22 = vector.broadcast %21 : vector<1x384xf32> to vector<72x384xf32>
    %23 = arith.addf %20, %22 : vector<72x384xf32>
    %cst_13 = arith.constant 0.000000e+00 : f32
    %24 = vector.broadcast %cst_13 : f32 to vector<72x384xf32>
    %25 = arith.maximumf %23, %24 : vector<72x384xf32>
    %26 = arith.truncf %25 : vector<72x384xf32> to vector<72x384xbf16>
    %27 = vector.extract_strided_slice %26 {offsets = [0, 0], sizes = [8, 384], strides = [1, 1]} : vector<72x384xbf16> to vector<8x384xbf16>
    %28 = vector.extract_strided_slice %26 {offsets = [8, 0], sizes = [8, 384], strides = [1, 1]} : vector<72x384xbf16> to vector<8x384xbf16>
    %29 = vector.extract_strided_slice %26 {offsets = [16, 0], sizes = [8, 384], strides = [1, 1]} : vector<72x384xbf16> to vector<8x384xbf16>
    %30 = vector.extract_strided_slice %26 {offsets = [24, 0], sizes = [8, 384], strides = [1, 1]} : vector<72x384xbf16> to vector<8x384xbf16>
    %31 = vector.extract_strided_slice %26 {offsets = [32, 0], sizes = [8, 384], strides = [1, 1]} : vector<72x384xbf16> to vector<8x384xbf16>
    %32 = vector.extract_strided_slice %26 {offsets = [40, 0], sizes = [8, 384], strides = [1, 1]} : vector<72x384xbf16> to vector<8x384xbf16>
    %33 = vector.extract_strided_slice %26 {offsets = [48, 0], sizes = [8, 384], strides = [1, 1]} : vector<72x384xbf16> to vector<8x384xbf16>
    %34 = vector.extract_strided_slice %26 {offsets = [56, 0], sizes = [8, 384], strides = [1, 1]} : vector<72x384xbf16> to vector<8x384xbf16>
    %35 = tpu.concatenate %27, %28, %29, %30 in 1 : vector<8x384xbf16>, vector<8x384xbf16>, vector<8x384xbf16>, vector<8x384xbf16> -> vector<8x1536xbf16>
    %36 = tpu.concatenate %29, %30, %31, %32 in 1 : vector<8x384xbf16>, vector<8x384xbf16>, vector<8x384xbf16>, vector<8x384xbf16> -> vector<8x1536xbf16>
    %37 = tpu.concatenate %31, %32, %33, %34 in 1 : vector<8x384xbf16>, vector<8x384xbf16>, vector<8x384xbf16>, vector<8x384xbf16> -> vector<8x1536xbf16>
    %38 = tpu.concatenate %35, %36, %37 in 0 : vector<8x1536xbf16>, vector<8x1536xbf16>, vector<8x1536xbf16> -> vector<24x1536xbf16>
    %c0_14 = arith.constant 0 : index
    %c0_15 = arith.constant 0 : index
    %39 = vector.load %arg4[%c0_14, %c0_15] : memref<1536x256xbf16, #tpu.memory_space<vmem>>, vector<1536x256xbf16>
    %cst_16 = arith.constant dense<0.000000e+00> : vector<24x256xf32>
    %40 = tpu.matmul %38, %39, %cst_16 {dimension_numbers = #tpu.dot_dimension_numbers<[1], [0], [0], [1], [0, 0, 1, 1], [], []>} : vector<24x1536xbf16>, vector<1536x256xbf16>, vector<24x256xf32> -> vector<24x256xf32>
    %c0_17 = arith.constant 0 : index
    %c0_18 = arith.constant 0 : index
    %41 = vector.load %arg5[%c0_17, %c0_18] : memref<1x256xf32, #tpu.memory_space<vmem>>, vector<1x256xf32>
    %42 = vector.broadcast %41 : vector<1x256xf32> to vector<24x256xf32>
    %43 = arith.addf %40, %42 : vector<24x256xf32>
    %cst_19 = arith.constant 0.000000e+00 : f32
    %44 = vector.broadcast %cst_19 : f32 to vector<24x256xf32>
    %45 = arith.maximumf %43, %44 : vector<24x256xf32>
    %46 = arith.truncf %45 : vector<24x256xf32> to vector<24x256xbf16>
    %47 = vector.extract_strided_slice %46 {offsets = [0, 0], sizes = [8, 256], strides = [1, 1]} : vector<24x256xbf16> to vector<8x256xbf16>
    %48 = vector.extract_strided_slice %46 {offsets = [8, 0], sizes = [8, 256], strides = [1, 1]} : vector<24x256xbf16> to vector<8x256xbf16>
    %49 = vector.extract_strided_slice %46 {offsets = [16, 0], sizes = [8, 256], strides = [1, 1]} : vector<24x256xbf16> to vector<8x256xbf16>
    %50 = tpu.concatenate %47, %48, %49 in 1 : vector<8x256xbf16>, vector<8x256xbf16>, vector<8x256xbf16> -> vector<8x768xbf16>
    %c0_20 = arith.constant 0 : index
    %c0_21 = arith.constant 0 : index
    %51 = vector.load %arg6[%c0_20, %c0_21] : memref<768x128xbf16, #tpu.memory_space<vmem>>, vector<768x128xbf16>
    %cst_22 = arith.constant dense<0.000000e+00> : vector<8x128xf32>
    %52 = tpu.matmul %50, %51, %cst_22 {dimension_numbers = #tpu.dot_dimension_numbers<[1], [0], [0], [1], [0, 0, 1, 1], [], []>} : vector<8x768xbf16>, vector<768x128xbf16>, vector<8x128xf32> -> vector<8x128xf32>
    %c0_23 = arith.constant 0 : index
    %c0_24 = arith.constant 0 : index
    %53 = vector.load %arg7[%c0_23, %c0_24] : memref<1x128xf32, #tpu.memory_space<vmem>>, vector<1x128xf32>
    %54 = vector.broadcast %53 : vector<1x128xf32> to vector<8x128xf32>
    %55 = arith.addf %52, %54 : vector<8x128xf32>
    %cst_25 = arith.constant 0.000000e+00 : f32
    %56 = vector.broadcast %cst_25 : f32 to vector<8x128xf32>
    %57 = arith.maximumf %55, %56 : vector<8x128xf32>
    %58 = arith.truncf %57 : vector<8x128xf32> to vector<8x128xbf16>
    %c0_26 = arith.constant 0 : index
    %c0_27 = arith.constant 0 : index
    %59 = vector.load %arg8[%c0_26, %c0_27] : memref<128x128xbf16, #tpu.memory_space<vmem>>, vector<128x128xbf16>
    %cst_28 = arith.constant dense<0.000000e+00> : vector<8x128xf32>
    %60 = tpu.matmul %58, %59, %cst_28 {dimension_numbers = #tpu.dot_dimension_numbers<[1], [0], [0], [1], [0, 0, 1, 1], [], []>} : vector<8x128xbf16>, vector<128x128xbf16>, vector<8x128xf32> -> vector<8x128xf32>
    %c0_29 = arith.constant 0 : index
    %c0_30 = arith.constant 0 : index
    %61 = vector.load %arg9[%c0_29, %c0_30] : memref<1x128xf32, #tpu.memory_space<vmem>>, vector<1x128xf32>
    %62 = vector.broadcast %61 : vector<1x128xf32> to vector<8x128xf32>
    %63 = arith.addf %60, %62 : vector<8x128xf32>
    %cst_31 = arith.constant 0.000000e+00 : f32
    %64 = vector.broadcast %cst_31 : f32 to vector<8x128xf32>
    %65 = arith.maximumf %63, %64 : vector<8x128xf32>
    %66 = arith.truncf %65 : vector<8x128xf32> to vector<8x128xbf16>
    %c0_32 = arith.constant 0 : index
    %c0_33 = arith.constant 0 : index
    %67 = vector.load %arg10[%c0_32, %c0_33] : memref<128x256xbf16, #tpu.memory_space<vmem>>, vector<128x256xbf16>
    %cst_34 = arith.constant dense<0.000000e+00> : vector<8x256xf32>
    %68 = tpu.matmul %66, %67, %cst_34 {dimension_numbers = #tpu.dot_dimension_numbers<[1], [0], [0], [1], [0, 0, 1, 1], [], []>} : vector<8x128xbf16>, vector<128x256xbf16>, vector<8x256xf32> -> vector<8x256xf32>
    %c0_35 = arith.constant 0 : index
    %c0_36 = arith.constant 0 : index
    %69 = vector.load %arg11[%c0_35, %c0_36] : memref<1x256xf32, #tpu.memory_space<vmem>>, vector<1x256xf32>
    %70 = vector.broadcast %69 : vector<1x256xf32> to vector<8x256xf32>
    %71 = arith.addf %68, %70 : vector<8x256xf32>
    %cst_37 = arith.constant 0.000000e+00 : f32
    %72 = vector.broadcast %cst_37 : f32 to vector<8x256xf32>
    %73 = arith.maximumf %71, %72 : vector<8x256xf32>
    %74 = arith.truncf %73 : vector<8x256xf32> to vector<8x256xbf16>
    %c0_38 = arith.constant 0 : index
    %c0_39 = arith.constant 0 : index
    %75 = vector.load %arg12[%c0_38, %c0_39] : memref<256x128xbf16, #tpu.memory_space<vmem>>, vector<256x128xbf16>
    %cst_40 = arith.constant dense<0.000000e+00> : vector<8x128xf32>
    %76 = tpu.matmul %74, %75, %cst_40 {dimension_numbers = #tpu.dot_dimension_numbers<[1], [0], [0], [1], [0, 0, 1, 1], [], []>} : vector<8x256xbf16>, vector<256x128xbf16>, vector<8x128xf32> -> vector<8x128xf32>
    %c0_41 = arith.constant 0 : index
    %c0_42 = arith.constant 0 : index
    %77 = vector.load %arg13[%c0_41, %c0_42] : memref<1x128xf32, #tpu.memory_space<vmem>>, vector<1x128xf32>
    %78 = vector.broadcast %77 : vector<1x128xf32> to vector<8x128xf32>
    %79 = arith.addf %76, %78 : vector<8x128xf32>
    %c0_43 = arith.constant 0 : index
    %c0_44 = arith.constant 0 : index
    %80 = vector.load %arg14[%c0_43, %c0_44] : memref<8x128xf32, #tpu.memory_space<vmem>>, vector<8x128xf32>
    tpu.vector_store %arg14[%c0_43, %c0_44], %79 {strides = array<i32>} : memref<8x128xf32, #tpu.memory_space<vmem>>, vector<8x128xf32>,
    return
  }
  func.func @transform_0(%arg0: i32) -> (i32, i32) {
    %c0_i32 = arith.constant 0 : i32
    %c0_i32_0 = arith.constant 0 : i32
    return %arg0, %c0_i32 : i32, i32
  }
  func.func @transform_1(%arg0: i32) -> (i32, i32) {
    %c0_i32 = arith.constant 0 : i32
    %c0_i32_0 = arith.constant 0 : i32
    %c0_i32_1 = arith.constant 0 : i32
    return %c0_i32, %c0_i32_0 : i32, i32
  }
  func.func @transform_2(%arg0: i32) -> (i32, i32) {
    %c0_i32 = arith.constant 0 : i32
    %c0_i32_0 = arith.constant 0 : i32
    %c0_i32_1 = arith.constant 0 : i32
    return %c0_i32, %c0_i32_0 : i32, i32
  }
  func.func @transform_3(%arg0: i32) -> (i32, i32) {
    %c0_i32 = arith.constant 0 : i32
    %c0_i32_0 = arith.constant 0 : i32
    %c0_i32_1 = arith.constant 0 : i32
    return %c0_i32, %c0_i32_0 : i32, i32
  }
  func.func @transform_4(%arg0: i32) -> (i32, i32) {
    %c0_i32 = arith.constant 0 : i32
    %c0_i32_0 = arith.constant 0 : i32
    %c0_i32_1 = arith.constant 0 : i32
    return %c0_i32, %c0_i32_0 : i32, i32
  }
  func.func @transform_5(%arg0: i32) -> (i32, i32) {
    %c0_i32 = arith.constant 0 : i32
    %c0_i32_0 = arith.constant 0 : i32
    %c0_i32_1 = arith.constant 0 : i32
    return %c0_i32, %c0_i32_0 : i32, i32
  }
  func.func @transform_6(%arg0: i32) -> (i32, i32) {
    %c0_i32 = arith.constant 0 : i32
    %c0_i32_0 = arith.constant 0 : i32
    %c0_i32_1 = arith.constant 0 : i32
    return %c0_i32, %c0_i32_0 : i32, i32
  }
  func.func @transform_7(%arg0: i32) -> (i32, i32) {
    %c0_i32 = arith.constant 0 : i32
    %c0_i32_0 = arith.constant 0 : i32
    %c0_i32_1 = arith.constant 0 : i32
    return %c0_i32, %c0_i32_0 : i32, i32
  }
  func.func @transform_8(%arg0: i32) -> (i32, i32) {
    %c0_i32 = arith.constant 0 : i32
    %c0_i32_0 = arith.constant 0 : i32
    %c0_i32_1 = arith.constant 0 : i32
    return %c0_i32, %c0_i32_0 : i32, i32
  }
  func.func @transform_9(%arg0: i32) -> (i32, i32) {
    %c0_i32 = arith.constant 0 : i32
    %c0_i32_0 = arith.constant 0 : i32
    %c0_i32_1 = arith.constant 0 : i32
    return %c0_i32, %c0_i32_0 : i32, i32
  }
  func.func @transform_10(%arg0: i32) -> (i32, i32) {
    %c0_i32 = arith.constant 0 : i32
    %c0_i32_0 = arith.constant 0 : i32
    %c0_i32_1 = arith.constant 0 : i32
    return %c0_i32, %c0_i32_0 : i32, i32
  }
  func.func @transform_11(%arg0: i32) -> (i32, i32) {
    %c0_i32 = arith.constant 0 : i32
    %c0_i32_0 = arith.constant 0 : i32
    %c0_i32_1 = arith.constant 0 : i32
    return %c0_i32, %c0_i32_0 : i32, i32
  }
  func.func @transform_12(%arg0: i32) -> (i32, i32) {
    %c0_i32 = arith.constant 0 : i32
    %c0_i32_0 = arith.constant 0 : i32
    %c0_i32_1 = arith.constant 0 : i32
    return %c0_i32, %c0_i32_0 : i32, i32
  }
  func.func @transform_13(%arg0: i32) -> (i32, i32) {
    %c0_i32 = arith.constant 0 : i32
    %c0_i32_0 = arith.constant 0 : i32
    return %arg0, %c0_i32 : i32, i32
  }
}

</mosaic_0001>

<bundles_post_ra>
// kernel: _lambda_.1
= control target key start
LH: loop header
LB: loop body
LE: loop exit
PB: predicated region body
PF: predicated region fallthrough
CT: control target
= control target key end

     0   :  { %18 = vsyncpa [#allocation3], 0  ;;  %s5755_s0 = inlined_call_operand.vmem [shape: f32[8,1024], index: 0, kind: input, shape index: {}]   ;;  %s5756_s1 = inlined_call_operand.vmem [shape: bf16[512,384], index: 1, kind: input, shape index: {}]   ;;  %s5757_s2 = inlined_call_operand.vmem [shape: f32[1,384], index: 2, kind: input, shape index: {}]   ;;  %s5758_s3 = inlined_call_operand.hbm [shape: bf16[1536,256], index: 3, kind: input, shape index: {}]   ;;  %s5759_s4 = inlined_call_operand.vmem [shape: f32[1,256], index: 4, kind: input, shape index: {}]   ;;  %s5760_s5 = inlined_call_operand.vmem [shape: bf16[768,128], index: 5, kind: input, shape index: {}]   ;;  %s5761_s6 = inlined_call_operand.vmem [shape: f32[1,128], index: 6, kind: input, shape index: {}]   ;;  %s5762_s7 = inlined_call_operand.vmem [shape: bf16[128,128], index: 7, kind: input, shape index: {}]   ;;  %s5763_s8 = inlined_call_operand.vmem [shape: f32[1,128], index: 8, kind: input, shape index: {}]   ;;  %s5764_s9 = inlined_call_operand.hbm [shape: bf16[128,256], index: 9, kind: input, shape index: {}]   ;;  %s5765_s10 = inlined_call_operand.vmem [shape: f32[1,256], index: 10, kind: input, shape index: {}]   ;;  %s5766_s11 = inlined_call_operand.hbm [shape: bf16[256,128], index: 11, kind: input, shape index: {}]   ;;  %s5767_s12 = inlined_call_operand.vmem [shape: f32[1,128], index: 12, kind: input, shape index: {}]   ;;  %s5768_s13 = inlined_call_operand.vmem [shape: f32[8,128], index: 13, kind: output, shape index: {}]  }
   0x1   :  { %19 = vsyncpa [#allocation5], 0  ;;  %s4902_s25 = smov [#allocation4]   ;;  %s4903_s27 = smov [#allocation2]  }
   0x2   :  { %s53_s26 = sshll.u32 %s4902_s25, 4  ;;  %s31_s28 = sshll.u32 %s4903_s27, 4  ;;  %s54_s26 = int_to_ptr.vmem [resolvable:$true] %s53_s26  ;;  %s32_s28 = int_to_ptr.vmem [resolvable:$true] %s31_s28 }
   0x3   :  { %s4846_s29 = scalar_lea.vmem %s54_s26, 2048  ;;  %p4851_p1 = scmp.lt.s32.totalorder %s54_s26, %s54_s26 }
   0x4   :  { %p4847_p0 = scmp.ne.s32.totalorder %s54_s26, %s4846_s29  ;;  %p4852_p2 = scmp.lt.s32.totalorder %s4846_s29, %s4846_s29 }
   0x6   :  { %p4853_p3 = por %p4852_p2, %p4851_p1 }
   0x8   :  { %p4854_p4 = pnand %p4853_p3, %p4847_p0 }
   0xa   :  { %4857 = shalt.err (!%p4854_p4)
}
   0xb   :  { %s4904_s30 = smov 128   ;;  %s4905_s14 = smov 8  }
   0xc   :  { %59 = dma.hbm_to_vmem [thread:$0]  %s5764_s9, 2048, %s54_s26, [#allocation5], %s4904_s30, %s4904_s30, %s4905_s14  }
   0xd   :  { %s4866_s17 = scalar_lea.vmem %s32_s28, 24576  ;;  %p4871_p6 = scmp.lt.s32.totalorder %s32_s28, %s32_s28 }
   0xe   :  { %p4867_p5 = scmp.ne.s32.totalorder %s32_s28, %s4866_s17  ;;  %p4872_p7 = scmp.lt.s32.totalorder %s4866_s17, %s4866_s17 }
  0x10   :  { %p4873_p8 = por %p4872_p7, %p4871_p6 }
  0x12   :  { %p4874_p9 = pnand %p4873_p8, %p4867_p5 }
  0x14   :  { %4877 = shalt.err (!%p4874_p9)
}
  0x15   :  { %37 = dma.hbm_to_vmem [thread:$0]  %s5758_s3, 24576, %s32_s28, [#allocation3], %s4904_s30, %s4904_s30, %s4905_s14  }
  0x16   :  { %s4906_s20 = smov [#allocation6]  }
  0x17   :  { %s67_s21 = sshll.u32 %s4906_s20, 4  ;;  %s68_s21 = int_to_ptr.vmem [resolvable:$true] %s67_s21 }
  0x18   :  { %s4886_s22 = scalar_lea.vmem %s68_s21, 2048  ;;  %p4891_p11 = scmp.lt.s32.totalorder %s68_s21, %s68_s21 }
  0x19   :  { %p4887_p10 = scmp.ne.s32.totalorder %s68_s21, %s4886_s22  ;;  %p4892_p12 = scmp.lt.s32.totalorder %s4886_s22, %s4886_s22 }
  0x1b   :  { %p4893_p13 = por %p4892_p12, %p4891_p11 }
  0x1d   :  { %p4894_p0 = pnand %p4893_p13, %p4887_p10 }
  0x1f   :  { %4897 = shalt.err (!%p4894_p0)
}
  0x20   :  { %s4907_s9 = smov 64   ;;  %s4908_s23 = smov 4  }
  0x21   :  { %73 = dma.hbm_to_vmem [thread:$0]  %s5766_s11, 2048, %s68_s21, [#allocation5], %s4907_s9, %s4907_s9, %s4908_s23  }
  0x22   :  { %4898 = dma.done.wait [#allocation3], 24576  }
  0x23   :  { %4899 = vsyncadd [#allocation3], 4294942720 }
  0x24   :  { %4900 = dma.done.wait [#allocation5], 4096  }
  0x25   :  { %4901 = vsyncadd [#allocation5], 4294963200  ;;  %v87_v0 = vld [vmem:[%s5755_s0 + $0x8] sm:$0xff]  ;;  %v86_v1 = vld [vmem:[%s5755_s0] sm:$0xff]  ;;  %vm130_vm0 = vcmask 523264   ;;  %vm169_vm1 = vcmask 1043456  }
  0x26   :  { %v88_v2 = vld [vmem:[%s5755_s0 + $0x10] sm:$0xff]  ;;  %v5002_v3 = vpack.c.bf16 %v87_v0, %v87_v0  ;;  %v5004_v4 = vpack.c.bf16 %v86_v1, %v86_v1  ;;  %v89_v6 = vld [vmem:[%s5755_s0 + $0x18] sm:$0xff]  ;;  %v94_v8 = vld [vmem:[%s5755_s0 + $0x20] sm:$0xff]  ;;  %vm4910_vm2 = vmmov 0  }
  0x27   :  { %v5006_v5 = vpack.c.bf16 %v88_v2, %v88_v2  ;;  %v5011_v7 = vpack.c.bf16 %v89_v6, %v89_v6  ;;  %v96_v9 = vld [vmem:[%s5755_s0 + $0x28] sm:$0xff]  ;;  %v98_v13 = vld [vmem:[%s5755_s0 + $0x30] sm:$0xff]  ;;  %v5034_v17 = vpack.c.bf16 %v94_v8, %v94_v8  ;;  %v4340_v29 = vld [vmem:[%s5756_s1 + $0x78] ss:$12 sps:$4 sm:$0xff]  }
  0x28   :  { %v116_v10 = vrot.slane %v5002_v3, 4  ;;  %v115_v11 = vrot.slane %v5004_v4, 4  ;;  %v4326_v12 = vld [vmem:[%s5756_s1 + $0xac] ss:$12 sps:$4 sm:$0xff]   ;;  %v4328_v14 = vld [vmem:[%s5756_s1 + $0xa8] ss:$12 sps:$4 sm:$0xff]   ;;  %v5036_v18 = vpack.c.bf16 %v96_v9, %v96_v9  ;;  %v5057_v26 = vpack.c.bf16 %v98_v13, %v98_v13 }
  0x29   :  { %v117_v15 = vrot.slane %v5006_v5, 4  ;;  %v118_v16 = vrot.slane %v5011_v7, 4  ;;  %v4329_v19 = vld [vmem:[%s5756_s1 + $0x22c] ss:$12 sps:$4 sm:$0xff]   ;;  %864 = vmatprep.subr.bf16.mxu0 %v4326_v12  ;;  %v4331_v20 = vld [vmem:[%s5756_s1 + $0x94] ss:$12 sps:$4 sm:$0xff]  }
  0x2a   :  { %122 = vrot.lane.b32.xlu0 %v116_v10, %s4907_s9  ;;  %120 = vrot.lane.b32.xlu1 %v115_v11, %s4907_s9  ;;  %v4333_v21 = vld [vmem:[%s5756_s1 + $0x228] ss:$12 sps:$4 sm:$0xff]   ;;  %v4334_v22 = vld [vmem:[%s5756_s1 + $0x90] ss:$12 sps:$4 sm:$0xff]   ;;  %v119_v24 = vrot.slane %v5034_v17, 4  ;;  %v136_v25 = vrot.slane %v5036_v18, 4 }
  0x2b   :  { %865 = vmatpush1.bf16.msra.mxu0 %v4328_v14  ;;  %943 = vmatprep.subr.bf16.mxu1 %v4329_v19  ;;  %v4335_v23 = vld [vmem:[%s5756_s1 + $0x214] ss:$12 sps:$4 sm:$0xff]   ;;  %v4337_v27 = vld [vmem:[%s5756_s1 + $0x7c] ss:$12 sps:$4 sm:$0xff]   ;;  %v4343_v31 = vld [vmem:[%s5756_s1 + $0x64] ss:$12 sps:$4 sm:$0xff]  }
  0x2c   :  { %866 = vmatprep.subr.bf16.mxu0 %v4331_v20  ;;  %944 = vmatpush1.bf16.msra.mxu1 %v4333_v21  ;;  %v4339_v28 = vld [vmem:[%s5756_s1 + $0x210] ss:$12 sps:$4 sm:$0xff]   ;;  %v141_v32 = vrot.slane %v5057_v26, 4  ;;  %v4345_v34 = vld [vmem:[%s5756_s1 + $0x1f8] ss:$12 sps:$4 sm:$0xff]  }
  0x2d   :  { %945 = vmatprep.subr.bf16.mxu1 %v4335_v23  ;;  %v4341_v30 = vld [vmem:[%s5756_s1 + $0x1fc] ss:$12 sps:$4 sm:$0xff]   ;;  %v4346_v35 = vld [vmem:[%s5756_s1 + $0x60] ss:$12 sps:$4 sm:$0xff]   ;;  %v4347_v36 = vld [vmem:[%s5756_s1 + $0x1e4] ss:$12 sps:$4 sm:$0xff]  }
  0x2e   :  { %124 = vrot.lane.b32.xlu0 %v117_v15, %s4907_s9  ;;  %126 = vrot.lane.b32.xlu1 %v118_v16, %s4907_s9  ;;  %v104_v33 = vld [vmem:[%s5755_s0 + $0x38] sm:$0xff]  ;;  %v4351_v39 = vld [vmem:[%s5756_s1 + $0x1e0] ss:$12 sps:$4 sm:$0xff]  }
  0x2f   :  { %867 = vmatpush1.bf16.msra.mxu0 %v4334_v22  ;;  %v4349_v37 = vld [vmem:[%s5756_s1 + $0x4c] ss:$12 sps:$4 sm:$0xff]   ;;  %v5094_v38 = vpack.c.bf16 %v104_v33, %v104_v33  ;;  %v4352_v40 = vld [vmem:[%s5756_s1 + $0x48] ss:$12 sps:$4 sm:$0xff]   ;;  %v4358_v45 = vld [vmem:[%s5756_s1 + $0x30] ss:$12 sps:$4 sm:$0xff]  }
  0x30   :  { %868 = vmatprep.subr.bf16.mxu0 %v4337_v27  ;;  %946 = vmatpush1.bf16.msra.mxu1 %v4339_v28  ;;  %v4353_v41 = vld [vmem:[%s5756_s1 + $0x1cc] ss:$12 sps:$4 sm:$0xff]   ;;  %v4355_v42 = vld [vmem:[%s5756_s1 + $0x34] ss:$12 sps:$4 sm:$0xff]   ;;  %v4361_v47 = vld [vmem:[%s5756_s1 + $0x1c] ss:$12 sps:$4 sm:$0xff]  }
  0x31   :  { %947 = vmatprep.subr.bf16.mxu1 %v4341_v30  ;;  %v154_v43 = vrot.slane %v5094_v38, 4  ;;  %v4357_v44 = vld [vmem:[%s5756_s1 + $0x1c8] ss:$12 sps:$4 sm:$0xff]   ;;  %v4363_v48 = vld [vmem:[%s5756_s1 + $0x1b0] ss:$12 sps:$4 sm:$0xff]  }
  0x32   :  { %128 = vrot.lane.b32.xlu0 %v119_v24, %s4907_s9  ;;  %137 = vrot.lane.b32.xlu1 %v136_v25, %s4907_s9  ;;  %v4359_v46 = vld [vmem:[%s5756_s1 + $0x1b4] ss:$12 sps:$4 sm:$0xff]   ;;  %v4364_v49 = vld [vmem:[%s5756_s1 + $0x18] ss:$12 sps:$4 sm:$0xff]  }
  0x33   :  { %869 = vmatpush1.bf16.msra.mxu0 %v4340_v29  ;;  %v4365_v50 = vld [vmem:[%s5756_s1 + $0x19c] ss:$12 sps:$4 sm:$0xff]   ;;  %v4367_v51 = vld [vmem:[%s5756_s1 + $0x4] ss:$12 sps:$4 sm:$0xff]   ;;  %v4370_v53 = vld [vmem:[%s5756_s1] ss:$12 sps:$4 sm:$0xff]  }
  0x34   :  { %870 = vmatprep.subr.bf16.mxu0 %v4343_v31  ;;  %948 = vmatpush1.bf16.msra.mxu1 %v4345_v34  ;;  %v4369_v52 = vld [vmem:[%s5756_s1 + $0x198] ss:$12 sps:$4 sm:$0xff]   ;;  %v4375_v56 = vld [vmem:[%s5756_s1 + $0x180] ss:$12 sps:$4 sm:$0xff]   ;;  %v4376_v57 = vld [vmem:[%s5756_s1 + $0x168] ss:$12 sps:$4 sm:$0xff]  }
  0x35   :  { %949 = vmatprep.subr.bf16.mxu1 %v4347_v36  ;;  %v4371_v54 = vld [vmem:[%s5756_s1 + $0x184] ss:$12 sps:$4 sm:$0xff]   ;;  %v4373_v55 = vld [vmem:[%s5756_s1 + $0x16c] ss:$12 sps:$4 sm:$0xff]   ;;  %v4379_v59 = vld [vmem:[%s5756_s1 + $0x154] ss:$12 sps:$4 sm:$0xff]  }
  0x36   :  { %142 = vrot.lane.b32.xlu0 %v141_v32, %s4907_s9  ;;  %157 = vrot.lane.b32.xlu1 %v119_v24, %s4907_s9  ;;  %v4377_v58 = vld [vmem:[%s5756_s1 + $0x2ec] ss:$12 sps:$4 sm:$0xff]   ;;  %v4381_v60 = vld [vmem:[%s5756_s1 + $0x2e8] ss:$12 sps:$4 sm:$0xff]  }
  0x37   :  { %871 = vmatpush1.bf16.msra.mxu0 %v4346_v35  ;;  %v4382_v61 = vld [vmem:[%s5756_s1 + $0x150] ss:$12 sps:$4 sm:$0xff]   ;;  %v4383_v62 = vld [vmem:[%s5756_s1 + $0x2d4] ss:$12 sps:$4 sm:$0xff]   ;;  %v4388_v1 = vld [vmem:[%s5756_s1 + $0x138] ss:$12 sps:$4 sm:$0xff]  }
  0x38   :  { %872 = vmatprep.subr.bf16.mxu0 %v4349_v37  ;;  %950 = vmatpush1.bf16.msra.mxu1 %v4351_v39  ;;  %v4385_v63 = vld [vmem:[%s5756_s1 + $0x13c] ss:$12 sps:$4 sm:$0xff]   ;;  %v4391_v6 = vld [vmem:[%s5756_s1 + $0x124] ss:$12 sps:$4 sm:$0xff]   ;;  %v4394_v9 = vld [vmem:[%s5756_s1 + $0x120] ss:$12 sps:$4 sm:$0xff]  }
  0x39   :  { %951 = vmatprep.subr.bf16.mxu1 %v4353_v41  ;;  %v4387_v0 = vld [vmem:[%s5756_s1 + $0x2d0] ss:$12 sps:$4 sm:$0xff]   ;;  %v4393_v8 = vld [vmem:[%s5756_s1 + $0x2b8] ss:$12 sps:$4 sm:$0xff]   ;;  %v4399_v12 = vld [vmem:[%s5756_s1 + $0x2a0] ss:$12 sps:$4 sm:$0xff]  }
  0x3a   :  { %159 = vrot.lane.b32.xlu0 %v136_v25, %s4907_s9  ;;  %155 = vrot.lane.b32.xlu1 %v118_v16, %s4907_s9  ;;  %v4389_v2 = vld [vmem:[%s5756_s1 + $0x2bc] ss:$12 sps:$4 sm:$0xff]   ;;  %v4395_v10 = vld [vmem:[%s5756_s1 + $0x2a4] ss:$12 sps:$4 sm:$0xff]  }
  0x3b   :  { %873 = vmatpush1.bf16.msra.mxu0 %v4352_v40  ;;  %v4397_v11 = vld [vmem:[%s5756_s1 + $0x10c] ss:$12 sps:$4 sm:$0xff]   ;;  %v4400_v13 = vld [vmem:[%s5756_s1 + $0x108] ss:$12 sps:$4 sm:$0xff]   ;;  %v4406_v19 = vld [vmem:[%s5756_s1 + $0xf0] ss:$12 sps:$4 sm:$0xff]  }
  0x3c   :  { %874 = vmatprep.subr.bf16.mxu0 %v4355_v42  ;;  %952 = vmatpush1.bf16.msra.mxu1 %v4357_v44  ;;  %v4401_v14 = vld [vmem:[%s5756_s1 + $0x28c] ss:$12 sps:$4 sm:$0xff]   ;;  %v4403_v15 = vld [vmem:[%s5756_s1 + $0xf4] ss:$12 sps:$4 sm:$0xff]   ;;  %v4409_v21 = vld [vmem:[%s5756_s1 + $0xdc] ss:$12 sps:$4 sm:$0xff]  }
  0x3d   :  { %953 = vmatprep.subr.bf16.mxu1 %v4359_v46  ;;  %v4405_v16 = vld [vmem:[%s5756_s1 + $0x288] ss:$12 sps:$4 sm:$0xff]   ;;  %v4411_v22 = vld [vmem:[%s5756_s1 + $0x270] ss:$12 sps:$4 sm:$0xff]   ;;  %v4412_v23 = vld [vmem:[%s5756_s1 + $0xd8] ss:$12 sps:$4 sm:$0xff]  }
  0x3e   :  { %161 = vrot.lane.b32.xlu0 %v141_v32, %s4907_s9  ;;  %163 = vrot.lane.b32.xlu1 %v154_v43, %s4907_s9  ;;  %v4407_v20 = vld [vmem:[%s5756_s1 + $0x274] ss:$12 sps:$4 sm:$0xff]   ;;  %v4413_v24 = vld [vmem:[%s5756_s1 + $0x25c] ss:$12 sps:$4 sm:$0xff]  }
  0x3f   :  { %875 = vmatpush1.bf16.msra.mxu0 %v4358_v45  ;;  %v4415_v25 = vld [vmem:[%s5756_s1 + $0xc4] ss:$12 sps:$4 sm:$0xff]   ;;  %v4418_v28 = vld [vmem:[%s5756_s1 + $0xc0] ss:$12 sps:$4 sm:$0xff]  }
  0x40   :  { %876 = vmatprep.subr.bf16.mxu0 %v4361_v47  ;;  %954 = vmatpush1.bf16.msra.mxu1 %v4363_v48  ;;  %v4417_v27 = vld [vmem:[%s5756_s1 + $0x258] ss:$12 sps:$4 sm:$0xff]   ;;  %v4422_v30 = vld [vmem:[%s5756_s1 + $0x170] ss:$12 sps:$4 sm:$0xff]   ;;  %v4421_v31 = vld [vmem:[%s5756_s1 + $0x240] ss:$12 sps:$4 sm:$0xff]  }
  0x41   :  { %955 = vmatprep.subr.bf16.mxu1 %v4365_v50  ;;  %v4419_v29 = vld [vmem:[%s5756_s1 + $0x244] ss:$12 sps:$4 sm:$0xff]  }
  0x42   :  { %v4424_v32 = vld [vmem:[%s5756_s1 + $0x2f0] ss:$12 sps:$4 sm:$0xff]   ;;  %v4426_v40 = vld [vmem:[%s5756_s1 + $0x158] ss:$12 sps:$4 sm:$0xff]  }
  0x43   :  { %877 = vmatpush1.bf16.msra.mxu0 %v4364_v49  ;;  %v4423_v35 = vld [vmem:[%s5756_s1 + $0xb0] ss:$12 sps:$4 sm:$0xff]  }
  0x44   :  { %878 = vmatprep.subr.bf16.mxu0 %v4367_v51  ;;  %956 = vmatpush1.bf16.msra.mxu1 %v4369_v52  ;;  %v4425_v45 = vld [vmem:[%s5756_s1 + $0x230] ss:$12 sps:$4 sm:$0xff]   ;;  %v4429_v52 = vld [vmem:[%s5756_s1 + $0x218] ss:$12 sps:$4 sm:$0xff]  }
  0x45   :  { %957 = vmatprep.subr.bf16.mxu1 %v4371_v54 }
  0x47   :  { %879 = vmatpush1.bf16.msra.mxu0 %v4370_v53 }
  0x48   :  { %880 = vmatprep.subr.bf16.mxu0 %v4373_v55  ;;  %958 = vmatpush1.bf16.msra.mxu1 %v4375_v56  ;;  %v4431_v55 = vld [vmem:[%s5756_s1 + $0x80] ss:$12 sps:$4 sm:$0xff]  }
  0x49   :  { %959 = vmatprep.subr.bf16.mxu1 %v4377_v58  ;;  %v4434_v58 = vld [vmem:[%s5756_s1 + $0x128] ss:$12 sps:$4 sm:$0xff]  }
  0x4b   :  { %881 = vmatpush2.bf16.msra.mxu0 %v4376_v57  ;;  %v4432_v57 = vld [vmem:[%s5756_s1 + $0x2c0] ss:$12 sps:$4 sm:$0xff]  }
  0x4c   :  { %882 = vmatprep.subr.bf16.mxu0 %v4379_v59  ;;  %960 = vmatpush2.bf16.msra.mxu1 %v4381_v60  ;;  %v4433_v59 = vld [vmem:[%s5756_s1 + $0x200] ss:$12 sps:$4 sm:$0xff]  }
  0x4d   :  { %961 = vmatprep.subr.bf16.mxu1 %v4383_v62  ;;  %v4435_v62 = vld [vmem:[%s5756_s1 + $0x68] ss:$12 sps:$4 sm:$0xff]  }
  0x4f   :  { %883 = vmatpush2.bf16.msra.mxu0 %v4382_v61 }
  0x50   :  { %884 = vmatprep.subr.bf16.mxu0 %v4385_v63  ;;  %962 = vmatpush2.bf16.msra.mxu1 %v4387_v0  ;;  %v4436_v63 = vld [vmem:[%s5756_s1 + $0x2a8] ss:$12 sps:$4 sm:$0xff]  }
  0x51   :  { %963 = vmatprep.subr.bf16.mxu1 %v4389_v2 }
  0x53   :  { %885 = vmatpush2.bf16.msra.mxu0 %v4388_v1  ;;  %v4438_v1 = vld [vmem:[%s5756_s1 + $0x110] ss:$12 sps:$4 sm:$0xff]  }
  0x54   :  { %886 = vmatprep.subr.bf16.mxu0 %v4391_v6  ;;  %964 = vmatpush2.bf16.msra.mxu1 %v4393_v8  ;;  %v4437_v6 = vld [vmem:[%s5756_s1 + $0x1e8] ss:$12 sps:$4 sm:$0xff]  }
  0x55   :  { %965 = vmatprep.subr.bf16.mxu1 %v4395_v10  ;;  %v4440_v10 = vld [vmem:[%s5756_s1 + $0x290] ss:$12 sps:$4 sm:$0xff]  }
  0x57   :  { %887 = vmatpush2.bf16.msra.mxu0 %v4394_v9  ;;  %v4439_v9 = vld [vmem:[%s5756_s1 + $0x50] ss:$12 sps:$4 sm:$0xff]  }
  0x58   :  { %888 = vmatprep.subr.bf16.mxu0 %v4397_v11  ;;  %966 = vmatpush2.bf16.msra.mxu1 %v4399_v12  ;;  %v4442_v12 = vld [vmem:[%s5756_s1 + $0xf8] ss:$12 sps:$4 sm:$0xff]  }
  0x59   :  { %967 = vmatprep.subr.bf16.mxu1 %v4401_v14 }
  0x5b   :  { %889 = vmatpush2.bf16.msra.mxu0 %v4400_v13 }
  0x5c   :  { %890 = vmatprep.subr.bf16.mxu0 %v4403_v15  ;;  %968 = vmatpush2.bf16.msra.mxu1 %v4405_v16  ;;  %v4441_v15 = vld [vmem:[%s5756_s1 + $0x1d0] ss:$12 sps:$4 sm:$0xff]  }
  0x5d   :  { %969 = vmatprep.subr.bf16.mxu1 %v4407_v20  ;;  %v4444_v20 = vld [vmem:[%s5756_s1 + $0x278] ss:$12 sps:$4 sm:$0xff]  }
  0x5f   :  { %891 = vmatpush2.bf16.msra.mxu0 %v4406_v19  ;;  %v4443_v19 = vld [vmem:[%s5756_s1 + $0x38] ss:$12 sps:$4 sm:$0xff]  }
  0x60   :  { %892 = vmatprep.subr.bf16.mxu0 %v4409_v21  ;;  %970 = vmatpush2.bf16.msra.mxu1 %v4411_v22  ;;  %v4446_v21 = vld [vmem:[%s5756_s1 + $0xe0] ss:$12 sps:$4 sm:$0xff]  }
  0x61   :  { %971 = vmatprep.subr.bf16.mxu1 %v4413_v24 }
  0x63   :  { %893 = vmatpush2.bf16.msra.mxu0 %v4412_v23  ;;  %v4445_v23 = vld [vmem:[%s5756_s1 + $0x1b8] ss:$12 sps:$4 sm:$0xff]  }
  0x64   :  { %894 = vmatprep.subr.bf16.mxu0 %v4415_v25  ;;  %972 = vmatpush2.bf16.msra.mxu1 %v4417_v27  ;;  %v4447_v25 = vld [vmem:[%s5756_s1 + $0x20] ss:$12 sps:$4 sm:$0xff]  }
  0x65   :  { %973 = vmatprep.subr.bf16.mxu1 %v4419_v29  ;;  %v4448_v27 = vld [vmem:[%s5756_s1 + $0x260] ss:$12 sps:$4 sm:$0xff]  }
  0x67   :  { %895 = vmatpush2.bf16.msra.mxu0 %v4418_v28  ;;  %v4450_v28 = vld [vmem:[%s5756_s1 + $0xc8] ss:$12 sps:$4 sm:$0xff]  }
  0x68   :  { %4107 = vmatprep.subr.bf16.mxu0 %v4422_v30  ;;  %974 = vmatpush2.bf16.msra.mxu1 %v4421_v31  ;;  %v4449_v30 = vld [vmem:[%s5756_s1 + $0x1a0] ss:$12 sps:$4 sm:$0xff]  }
  0x69   :  { %4153 = vmatprep.subr.bf16.mxu1 %v4424_v32  ;;  %v4451_v32 = vld [vmem:[%s5756_s1 + $0x8] ss:$12 sps:$4 sm:$0xff]  }
  0x9c   :  { %v123_v33 = vpop.permute.xlu0 %122  ;;  %v121_v34 = vpop.permute.xlu1 %120 }
  0x9d   :  { %v131_v36 = vsel %vm130_vm0, %v121_v34, %v123_v33 }
  0x9e   :  { %v5267_v44 = vsel %vm169_vm1, %v5004_v4, %v131_v36  ;;  %v4428_v4 = vld [vmem:[%s5756_s1 + $0x2d8] ss:$12 sps:$4 sm:$0xff]  }
  0x9f   :  { %v4454_v36 = vld [vmem:[#allocation2 + $0x70] ss:$8 sps:$4 sm:$0xff]  }
  0xa0   :  { %v125_v37 = vpop.permute.xlu0 %124  ;;  %v127_v39 = vpop.permute.xlu1 %126 }
  0xa1   :  { %v132_v41 = vsel %vm130_vm0, %v123_v33, %v125_v37  ;;  %v133_v42 = vsel %vm130_vm0, %v125_v37, %v127_v39  ;;  %v4452_v33 = vld [vmem:[%s5756_s1 + $0x248] ss:$12 sps:$4 sm:$0xff]   ;;  %v4459_v37 = vld [vmem:[#allocation2 + $0x64] ss:$8 sps:$4 sm:$0xff]  }
  0xa2   :  { %v5262_v43 = vsel %vm169_vm1, %v5002_v3, %v132_v41  ;;  %v5274_v46 = vsel %vm169_vm1, %v5006_v5, %v133_v42  ;;  %v4427_v3 = vld [vmem:[%s5756_s1 + $0x98] ss:$12 sps:$4 sm:$0xff]   ;;  %v4430_v5 = vld [vmem:[%s5756_s1 + $0x140] ss:$12 sps:$4 sm:$0xff]  }
  0xa3   :  { %896 = vmatprep.mubr.bf16.mxu0 %v5262_v43  ;;  %v4460_v41 = vld [vmem:[#allocation2 + $0x50] ss:$8 sps:$4 sm:$0xff]   ;;  %v4465_v42 = vld [vmem:[#allocation2 + $0x44] ss:$8 sps:$4 sm:$0xff]  }
  0xa4   :  { %v129_v47 = vpop.permute.xlu0 %128  ;;  %897 = vmatmul.mubr.bf16.vlgmr.msra.gmra.mxu0 %v5267_v44  ;;  %v138_v48 = vpop.permute.xlu1 %137 }
  0xa5   :  { %v134_v49 = vsel %vm130_vm0, %v127_v39, %v129_v47  ;;  %v139_v50 = vsel %vm130_vm0, %v129_v47, %v138_v48  ;;  %906 = vmatprep.mubr.bf16.mxu0 %v5274_v46  ;;  %4108 = vmatpush3.bf16.msra.mxu0 %v4423_v35  ;;  %v4453_v35 = vld [vmem:[%s5756_s1 + $0x188] ss:$12 sps:$4 sm:$0xff]  }
  0xa6   :  { %v5291_v51 = vsel %vm169_vm1, %v5011_v7, %v134_v49  ;;  %4109 = vmatprep.subr.bf16.mxu0 %v4426_v40  ;;  %v5300_v53 = vsel %vm169_vm1, %v5034_v17, %v139_v50  ;;  %v4457_v39 = vld [vmem:[#allocation2 + $0x60] ss:$8 sps:$4 sm:$0xff]   ;;  %v4462_v40 = vld [vmem:[#allocation2 + $0x54] ss:$8 sps:$4 sm:$0xff]   ;;  %v4477_v49 = vld [vmem:[#allocation2 + $0x4] ss:$8 sps:$4 sm:$0xff]  }
  0xa7   :  { %975 = vmatprep.mubr.bf16.mxu1 %v5291_v51  ;;  %v4468_v47 = vld [vmem:[#allocation2 + $0x34] ss:$8 sps:$4 sm:$0xff]   ;;  %v4475_v50 = vld [vmem:[#allocation2] ss:$8 sps:$4 sm:$0xff]  }
  0xa8   :  { %976 = vmatmul.mubr.bf16.vlgmr.msra.gmra.mxu1 %v5274_v46  ;;  %v143_v54 = vpop.permute.xlu0 %142  ;;  %v158_v56 = vpop.permute.xlu1 %157 }
  0xa9   :  { %4154 = vmatpush3.bf16.msra.mxu1 %v4425_v45  ;;  %985 = vmatprep.mubr.bf16.mxu1 %v5300_v53  ;;  %v144_v0 = vsel %vm130_vm0, %v138_v48, %v143_v54  ;;  %v4463_v45 = vld [vmem:[#allocation2 + $0x40] ss:$8 sps:$4 sm:$0xff]   ;;  %v4471_v48 = vld [vmem:[#allocation2 + $0x24] ss:$8 sps:$4 sm:$0xff]  }
  0xaa   :  { %4110 = vmatpush3.bf16.msra.mxu0 %v4427_v3  ;;  %4155 = vmatprep.subr.bf16.mxu1 %v4428_v4  ;;  %v5334_v8 = vsel %vm169_vm1, %v5036_v18, %v144_v0  ;;  %v4469_v3 = vld [vmem:[#allocation2 + $0x20] ss:$8 sps:$4 sm:$0xff]   ;;  %v4474_v4 = vld [vmem:[#allocation2 + $0x14] ss:$8 sps:$4 sm:$0xff]   ;;  %v4496_v0 = vld [vmem:[#allocation2 + $0xb0] ss:$8 sps:$4 sm:$0xff]  }
  0xab   :  { %4111 = vmatprep.subr.bf16.mxu0 %v4430_v5  ;;  %v4478_v5 = vld [vmem:[#allocation2 + $0xf0] ss:$8 sps:$4 sm:$0xff]   ;;  %v4481_v54 = vld [vmem:[#allocation2 + $0xe0] ss:$8 sps:$4 sm:$0xff]  }
  0xac   :  { %907 = vmatmul.mubr.bf16.gmra.mxu0 %v5262_v43  ;;  %v160_v60 = vpop.permute.xlu0 %159  ;;  %v156_v61 = vpop.permute.xlu1 %155 }
  0xad   :  { %916 = vmatprep.mubr.bf16.mxu0 %v5291_v51  ;;  %4156 = vmatpush3.bf16.msra.mxu1 %v4429_v52  ;;  %v166_v2 = vsel %vm130_vm0, %v158_v56, %v160_v60  ;;  %v165_v24 = vsel %vm130_vm0, %v156_v61, %v158_v56  ;;  %v4487_v52 = vld [vmem:[#allocation2 + $0x170] ss:$8 sps:$4 sm:$0xff]   ;;  %v4493_v56 = vld [vmem:[#allocation2 + $0x160] ss:$8 sps:$4 sm:$0xff]   ;;  %v4507_v61 = vld [vmem:[#allocation2 + $0x144] ss:$8 sps:$4 sm:$0xff]  }
  0xae   :  { %4112 = vmatpush3.bf16.msra.mxu0 %v4431_v55  ;;  %4157 = vmatprep.subr.bf16.mxu1 %v4432_v57  ;;  %v5348_v13 = vsel %vm169_vm1, %v5034_v17, %v166_v2  ;;  %v5386_v29 = vsel %vm169_vm1, %v5011_v7, %v165_v24  ;;  %v4456_v7 = vld [vmem:[#allocation2 + $0x74] ss:$8 sps:$4 sm:$0xff]   ;;  %v4495_v55 = vld [vmem:[#allocation2 + $0x164] ss:$8 sps:$4 sm:$0xff]   ;;  %v4484_v57 = vld [vmem:[#allocation2 + $0xd0] ss:$8 sps:$4 sm:$0xff]  }
  0xaf   :  { %4113 = vmatprep.subr.bf16.mxu0 %v4434_v58  ;;  %v4501_v58 = vld [vmem:[#allocation2 + $0x154] ss:$8 sps:$4 sm:$0xff]   ;;  %v4504_v2 = vld [vmem:[#allocation2 + $0xa4] ss:$8 sps:$4 sm:$0xff]   ;;  %v4547_v24 = vld [vmem:[#allocation2 + $0x1d0] ss:$8 sps:$4 sm:$0xff]  }
  0xb0   :  { %986 = vmatmul.mubr.bf16.gmra.mxu1 %v5291_v51  ;;  %v164_v11 = vpop.permute.xlu1 %163  ;;  %v162_v14 = vpop.permute.xlu0 %161 }
  0xb1   :  { %995 = vmatprep.mubr.bf16.mxu1 %v5334_v8  ;;  %4158 = vmatpush3.bf16.msra.mxu1 %v4433_v59  ;;  %v168_v16 = vsel %vm130_vm0, %v162_v14, %v164_v11  ;;  %v167_v31 = vsel %vm130_vm0, %v160_v60, %v162_v14  ;;  %v4492_v59 = vld [vmem:[#allocation2 + $0xc4] ss:$8 sps:$4 sm:$0xff]   ;;  %v4499_v60 = vld [vmem:[#allocation2 + $0x150] ss:$8 sps:$4 sm:$0xff]   ;;  %v4514_v14 = vld [vmem:[#allocation2 + $0x80] ss:$8 sps:$4 sm:$0xff]  }
  0xb2   :  { %4114 = vmatpush3.bf16.msra.mxu0 %v4435_v62  ;;  %4159 = vmatprep.subr.bf16.mxu1 %v4436_v63  ;;  %v5367_v22 = vsel %vm169_vm1, %v5057_v26, %v168_v16  ;;  %v201_v34 = vsel %vm169_vm1, %v5036_v18, %v167_v31  ;;  %v4505_v62 = vld [vmem:[#allocation2 + $0x140] ss:$8 sps:$4 sm:$0xff]   ;;  %v4513_v63 = vld [vmem:[#allocation2 + $0x134] ss:$8 sps:$4 sm:$0xff]   ;;  %v4508_v11 = vld [vmem:[#allocation2 + $0x90] ss:$8 sps:$4 sm:$0xff]  }
  0xb3   :  { %4115 = vmatprep.subr.bf16.mxu0 %v4438_v1  ;;  %v4511_v1 = vld [vmem:[#allocation2 + $0x130] ss:$8 sps:$4 sm:$0xff]   ;;  %v4522_v16 = vld [vmem:[#allocation2 + $0x274] ss:$8 sps:$4 sm:$0xff]   ;;  %v4567_v31 = vld [vmem:[#allocation2 + $0x1a4] ss:$8 sps:$4 sm:$0xff]  }
  0xb4   :  { %917 = vmatmul.mubr.bf16.gmra.mxu0 %v5274_v46 }
  0xb5   :  { %926 = vmatprep.mubr.bf16.mxu0 %v5348_v13  ;;  %4160 = vmatpush3.bf16.msra.mxu1 %v4437_v6  ;;  %v4502_v6 = vld [vmem:[#allocation2 + $0xa0] ss:$8 sps:$4 sm:$0xff]  }
  0xb6   :  { %4116 = vmatpush3.bf16.msra.mxu0 %v4439_v9  ;;  %4161 = vmatprep.subr.bf16.mxu1 %v4440_v10  ;;  %v4510_v9 = vld [vmem:[#allocation2 + $0x94] ss:$8 sps:$4 sm:$0xff]  }
  0xb7   :  { %4117 = vmatprep.subr.bf16.mxu0 %v4442_v12  ;;  %v4525_v10 = vld [vmem:[#allocation2 + $0x114] ss:$8 sps:$4 sm:$0xff]   ;;  %v4523_v12 = vld [vmem:[#allocation2 + $0x110] ss:$8 sps:$4 sm:$0xff]  }
  0xb8   :  { %996 = vmatmul.mubr.bf16.gmra.mxu1 %v5300_v53 }
  0xb9   :  { %4162 = vmatpush3.bf16.msra.mxu1 %v4441_v15  ;;  %1005 = vmatprep.mubr.bf16.mxu1 %v5367_v22  ;;  %v4531_v15 = vld [vmem:[#allocation2 + $0x104] ss:$8 sps:$4 sm:$0xff]  }
  0xba   :  { %4118 = vmatpush3.bf16.msra.mxu0 %v4443_v19  ;;  %4163 = vmatprep.subr.bf16.mxu1 %v4444_v20  ;;  %v4529_v19 = vld [vmem:[#allocation2 + $0x100] ss:$8 sps:$4 sm:$0xff]   ;;  %v4537_v20 = vld [vmem:[#allocation2 + $0x1f4] ss:$8 sps:$4 sm:$0xff]  }
  0xbb   :  { %4119 = vmatprep.subr.bf16.mxu0 %v4446_v21  ;;  %v4535_v21 = vld [vmem:[#allocation2 + $0x1f0] ss:$8 sps:$4 sm:$0xff]  }
  0xbc   :  { %927 = vmatmul.mubr.bf16.gmra.mxu0 %v5386_v29 }
  0xbd   :  { %4164 = vmatpush3.bf16.msra.mxu1 %v4445_v23  ;;  %936 = vmatprep.mubr.bf16.mxu0 %v5036_v18  ;;  %v4543_v23 = vld [vmem:[#allocation2 + $0x1e4] ss:$8 sps:$4 sm:$0xff]  }
  0xbe   :  { %4120 = vmatpush3.bf16.msra.mxu0 %v4447_v25  ;;  %4165 = vmatprep.subr.bf16.mxu1 %v4448_v27  ;;  %v4549_v25 = vld [vmem:[#allocation2 + $0x1d4] ss:$8 sps:$4 sm:$0xff]   ;;  %v4555_v27 = vld [vmem:[#allocation2 + $0x1c4] ss:$8 sps:$4 sm:$0xff]  }
  0xbf   :  { %4121 = vmatprep.subr.bf16.mxu0 %v4450_v28  ;;  %v4553_v28 = vld [vmem:[#allocation2 + $0x1c0] ss:$8 sps:$4 sm:$0xff]  }
  0xc0   :  { %1006 = vmatmul.mubr.bf16.gmra.mxu1 %v201_v34 }
  0xc1   :  { %4166 = vmatpush3.bf16.msra.mxu1 %v4449_v30  ;;  %1015 = vmatprep.mubr.bf16.mxu1 %v5094_v38  ;;  %v4559_v30 = vld [vmem:[#allocation2 + $0x1b0] ss:$8 sps:$4 sm:$0xff]  }
  0xc2   :  { %4122 = vmatpush3.bf16.msra.mxu0 %v4451_v32  ;;  %4167 = vmatprep.subr.bf16.mxu1 %v4452_v33  ;;  %v4565_v32 = vld [vmem:[#allocation2 + $0x1a0] ss:$8 sps:$4 sm:$0xff]   ;;  %v4573_v33 = vld [vmem:[#allocation2 + $0x194] ss:$8 sps:$4 sm:$0xff]  }
  0xc3   :  { %2445 = vmatprep.subr.bf16.mxu0 %v4456_v7  ;;  %v4571_v7 = vld [vmem:[#allocation2 + $0x190] ss:$8 sps:$4 sm:$0xff]  }
  0xc4   :  { %937 = vmatmul.mubr.bf16.gmra.mxu0 %v5034_v17 }
  0xc5   :  { %1054 = vmatprep.mubr.bf16.mxu0 %v5262_v43  ;;  %4168 = vmatpush3.bf16.msra.mxu1 %v4453_v35  ;;  %v4577_v35 = vld [vmem:[#allocation2 + $0x180] ss:$8 sps:$4 sm:$0xff]  }
  0xc8   :  { %1016 = vmatmul.mubr.bf16.gmra.mxu1 %v5057_v26 }
  0xc9   :  { %1125 = vmatprep.mubr.bf16.mxu1 %v5291_v51 }
  0xcc   :  { %1055 = vmatmul.mubr.bf16.vlgmr.msra.gmra.mxu0 %v5267_v44  ;;  %v4466_v44 = vld [vmem:[#allocation2 + $0x30] ss:$8 sps:$4 sm:$0xff]  }
  0xcd   :  { %1062 = vmatprep.mubr.bf16.mxu0 %v5274_v46  ;;  %2446 = vmatpush1.bf16.msra.mxu0 %v4454_v36  ;;  %v4585_v36 = vld [vmem:[#allocation2 + $0x374] ss:$8 sps:$4 sm:$0xff]  }
  0xce   :  { %2447 = vmatprep.subr.bf16.mxu0 %v4459_v37  ;;  %v337_v37 = vlaneseq }
  0xd0   :  { %1126 = vmatmul.mubr.bf16.vlgmr.msra.gmra.mxu1 %v5274_v46 }
  0xd1   :  { %1133 = vmatprep.mubr.bf16.mxu1 %v5300_v53  ;;  %2448 = vmatpush1.bf16.msra.mxu0 %v4457_v39 }
  0xd2   :  { %2449 = vmatprep.subr.bf16.mxu0 %v4462_v40  ;;  %v5427_v40 = vshrl.u32 %v337_v37, 7 }
  0xd4   :  { %1063 = vmatmul.mubr.bf16.gmra.mxu0 %v5262_v43  ;;  %v4472_v43 = vld [vmem:[#allocation2 + $0x10] ss:$8 sps:$4 sm:$0xff]  }
  0xd5   :  { %1070 = vmatprep.mubr.bf16.mxu0 %v5291_v51  ;;  %2450 = vmatpush1.bf16.msra.mxu0 %v4460_v41 }
  0xd6   :  { %2451 = vmatprep.subr.bf16.mxu0 %v4465_v42 }
  0xd8   :  { %1134 = vmatmul.mubr.bf16.gmra.mxu1 %v5291_v51  ;;  %v4489_v51 = vld [vmem:[#allocation2 + $0x174] ss:$8 sps:$4 sm:$0xff]  }
  0xd9   :  { %1141 = vmatprep.mubr.bf16.mxu1 %v5334_v8  ;;  %2452 = vmatpush1.bf16.msra.mxu0 %v4463_v45  ;;  %v4517_v8 = vld [vmem:[#allocation2 + $0x120] ss:$8 sps:$4 sm:$0xff]  }
  0xda   :  { %2453 = vmatprep.subr.bf16.mxu0 %v4468_v47  ;;  %2496 = vmatprep.subr.bf16.mxu1 %v4489_v51  ;;  %v5430_v47 = vsub.s32 0, %v5427_v40 }
  0xdb   :  { %2497 = vmatpush1.bf16.msra.mxu1 %v4487_v52 }
  0xdc   :  { %1071 = vmatmul.mubr.bf16.gmra.mxu0 %v5274_v46  ;;  %v4480_v46 = vld [vmem:[#allocation2 + $0xf4] ss:$8 sps:$4 sm:$0xff]   ;;  %2498 = vmatprep.subr.bf16.mxu1 %v4495_v55 }
  0xdd   :  { %1078 = vmatprep.mubr.bf16.mxu0 %v5348_v13  ;;  %2454 = vmatpush1.bf16.msra.mxu0 %v4466_v44  ;;  %v4516_v13 = vld [vmem:[#allocation2 + $0x84] ss:$8 sps:$4 sm:$0xff]   ;;  %v5433_v44 = vsub.s32 1, %v5427_v40 }
  0xde   :  { %2455 = vmatprep.subr.bf16.mxu0 %v4471_v48 }
  0xdf   :  { %2499 = vmatpush1.bf16.msra.mxu1 %v4493_v56 }
  0xe0   :  { %1142 = vmatmul.mubr.bf16.gmra.mxu1 %v5300_v53  ;;  %v4483_v53 = vld [vmem:[#allocation2 + $0xe4] ss:$8 sps:$4 sm:$0xff]   ;;  %2500 = vmatprep.subr.bf16.mxu1 %v4501_v58 }
  0xe1   :  { %1149 = vmatprep.mubr.bf16.mxu1 %v5367_v22  ;;  %2456 = vmatpush1.bf16.msra.mxu0 %v4469_v3  ;;  %v4541_v22 = vld [vmem:[#allocation2 + $0x1e0] ss:$8 sps:$4 sm:$0xff]  }
  0xe2   :  { %2457 = vmatprep.subr.bf16.mxu0 %v4474_v4  ;;  %v5438_v4 = vld [vmem:[%s5757_s2] sm:$0x7] }
  0xe3   :  { %2501 = vmatpush1.bf16.msra.mxu1 %v4499_v60 }
  0xe4   :  { %1079 = vmatmul.mubr.bf16.gmra.mxu0 %v5386_v29  ;;  %2502 = vmatprep.subr.bf16.mxu1 %v4507_v61  ;;  %v4561_v29 = vld [vmem:[#allocation2 + $0x1b4] ss:$8 sps:$4 sm:$0xff]  }
  0xe5   :  { %2458 = vmatpush1.bf16.msra.mxu0 %v4472_v43  ;;  %1086 = vmatprep.mubr.bf16.mxu0 %v5036_v18  ;;  %v4486_v18 = vld [vmem:[#allocation2 + $0xd4] ss:$8 sps:$4 sm:$0xff]  }
  0xe6   :  { %2459 = vmatprep.subr.bf16.mxu0 %v4477_v49 }
  0xe7   :  { %2503 = vmatpush1.bf16.msra.mxu1 %v4505_v62 }
  0xe8   :  { %1150 = vmatmul.mubr.bf16.gmra.mxu1 %v201_v34  ;;  %2504 = vmatprep.subr.bf16.mxu1 %v4513_v63  ;;  %v4579_v34 = vld [vmem:[#allocation2 + $0x184] ss:$8 sps:$4 sm:$0xff]  }
  0xe9   :  { %2460 = vmatpush1.bf16.msra.mxu0 %v4475_v50  ;;  %1157 = vmatprep.mubr.bf16.mxu1 %v5094_v38  ;;  %v4490_v38 = vld [vmem:[#allocation2 + $0xc0] ss:$8 sps:$4 sm:$0xff]   ;;  %v5442_v50 = vrot.slane %v5438_v4, %v5430_v47 }
  0xea   :  { %2461 = vmatprep.subr.bf16.mxu0 %v4480_v46  ;;  %v5446_v46 = vrot.slane %v5438_v4, %v5433_v44 }
  0xeb   :  { %2505 = vmatpush1.bf16.msra.mxu1 %v4511_v1 }
  0xec   :  { %1087 = vmatmul.mubr.bf16.gmra.mxu0 %v5034_v17  ;;  %v4498_v17 = vld [vmem:[#allocation2 + $0xb4] ss:$8 sps:$4 sm:$0xff]  }
  0xed   :  { %2462 = vmatpush2.bf16.msra.mxu0 %v4478_v5 }
  0xee   :  { %2463 = vmatprep.subr.bf16.mxu0 %v4483_v53 }
  0xf0   :  { %1158 = vmatmul.mubr.bf16.gmra.mxu1 %v5057_v26  ;;  %v4519_v26 = vld [vmem:[#allocation2 + $0x124] ss:$8 sps:$4 sm:$0xff]  }
  0xf1   :  { %2464 = vmatpush2.bf16.msra.mxu0 %v4481_v54  ;;  %2506 = vmatprep.subr.bf16.mxu1 %v4519_v26 }
  0xf2   :  { %2465 = vmatprep.subr.bf16.mxu0 %v4486_v18  ;;  %2507 = vmatpush1.bf16.msra.mxu1 %v4517_v8 }
  0xf3   :  { %2508 = vmatprep.subr.bf16.mxu1 %v4525_v10 }
  0xf5   :  { %2466 = vmatpush2.bf16.msra.mxu0 %v4484_v57 }
  0xf6   :  { %2467 = vmatprep.subr.bf16.mxu0 %v4492_v59  ;;  %2509 = vmatpush1.bf16.msra.mxu1 %v4523_v12 }
  0xf7   :  { %2510 = vmatprep.subr.bf16.mxu1 %v4531_v15 }
  0xf9   :  { %2468 = vmatpush2.bf16.msra.mxu0 %v4490_v38 }
  0xfa   :  { %2469 = vmatprep.subr.bf16.mxu0 %v4498_v17  ;;  %2511 = vmatpush1.bf16.msra.mxu1 %v4529_v19 }
  0xfb   :  { %2512 = vmatprep.subr.bf16.mxu1 %v4537_v20 }
  0xfd   :  { %2470 = vmatpush2.bf16.msra.mxu0 %v4496_v0 }
  0xfe   :  { %2471 = vmatprep.subr.bf16.mxu0 %v4504_v2  ;;  %2513 = vmatpush2.bf16.msra.mxu1 %v4535_v21 }
  0xff   :  { %2514 = vmatprep.subr.bf16.mxu1 %v4543_v23 }
 0x101   :  { %2472 = vmatpush2.bf16.msra.mxu0 %v4502_v6 }
 0x102   :  { %2473 = vmatprep.subr.bf16.mxu0 %v4510_v9  ;;  %2515 = vmatpush2.bf16.msra.mxu1 %v4541_v22 }
 0x103   :  { %2516 = vmatprep.subr.bf16.mxu1 %v4549_v25 }
 0x105   :  { %2474 = vmatpush2.bf16.msra.mxu0 %v4508_v11 }
 0x106   :  { %2475 = vmatprep.subr.bf16.mxu0 %v4516_v13  ;;  %2517 = vmatpush2.bf16.msra.mxu1 %v4547_v24 }
 0x107   :  { %2518 = vmatprep.subr.bf16.mxu1 %v4555_v27 }
 0x109   :  { %2476 = vmatpush2.bf16.msra.mxu0 %v4514_v14 }
 0x10a   :  { %2547 = vmatprep.subr.bf16.mxu0 %v4522_v16  ;;  %2519 = vmatpush2.bf16.msra.mxu1 %v4553_v28 }
 0x10b   :  { %2520 = vmatprep.subr.bf16.mxu1 %v4561_v29 }
 0x10e   :  { %2521 = vmatpush2.bf16.msra.mxu1 %v4559_v30 }
 0x10f   :  { %2522 = vmatprep.subr.bf16.mxu1 %v4567_v31 }
 0x112   :  { %2523 = vmatpush2.bf16.msra.mxu1 %v4565_v32 }
 0x113   :  { %2524 = vmatprep.subr.bf16.mxu1 %v4573_v33 }
 0x116   :  { %2525 = vmatpush2.bf16.msra.mxu1 %v4571_v7 }
 0x117   :  { %2526 = vmatprep.subr.bf16.mxu1 %v4579_v34 }
 0x11a   :  { %2527 = vmatpush2.bf16.msra.mxu1 %v4577_v35 }
 0x11b   :  { %2598 = vmatprep.subr.bf16.mxu1 %v4585_v36 }
 0x164   :  { %v898_v39 = vpop.f32.mrf.mxu0 }
 0x165   :  { %v899_v18 = vadd.f32 %v898_v39, %v5442_v50 }
 0x166   :  { %v900_v41 = vpop.f32.mrf.mxu0 }
 0x167   :  { %v901_v57 = vadd.f32 %v900_v41, %v5446_v46 }
 0x168   :  { %v902_v42 = vpop.f32.mrf.mxu0  ;;  %v977_v45 = vpop.f32.mrf.mxu1 }
 0x169   :  { %v903_v52 = vadd.f32 %v902_v42, %v5442_v50  ;;  %v978_v63 = vadd.f32 %v977_v45, %v899_v18 }
 0x16a   :  { %v904_v48 = vpop.f32.mrf.mxu0  ;;  %v979_v3 = vpop.f32.mrf.mxu1 }
 0x16b   :  { %v905_v53 = vadd.f32 %v904_v48, %v5446_v46  ;;  %v980_v0 = vadd.f32 %v979_v3, %v901_v57  ;;  %v1164_v16 = vmax.f32 %v978_v63, 0.0 }
 0x16c   :  { %v908_v43 = vpop.f32.mrf.mxu0  ;;  %v981_v49 = vpop.f32.mrf.mxu1 }
 0x16d   :  { %v909_v56 = vadd.f32 %v908_v43, %v5442_v50  ;;  %v982_v58 = vadd.f32 %v981_v49, %v903_v52  ;;  %v1165_v19 = vmax.f32 %v980_v0, 0.0  ;;  %v4520_v52 = vld [vmem:[#allocation2 + $0x270] ss:$8 sps:$4 sm:$0xff]  }
 0x16e   :  { %v910_v5 = vpop.f32.mrf.mxu0  ;;  %v983_v51 = vpop.f32.mrf.mxu1 }
 0x16f   :  { %v984_v59 = vadd.f32 %v983_v51, %v905_v53  ;;  %v911_v38 = vadd.f32 %v910_v5, %v5446_v46  ;;  %v1167_v9 = vmax.f32 %v982_v58, 0.0  ;;  %v4528_v58 = vld [vmem:[#allocation2 + $0x264] ss:$8 sps:$4 sm:$0xff]  }
 0x170   :  { %v912_v54 = vpop.f32.mrf.mxu0  ;;  %v987_v55 = vpop.f32.mrf.mxu1 }
 0x171   :  { %v913_v62 = vadd.f32 %v912_v54, %v5442_v50  ;;  %v988_v17 = vadd.f32 %v987_v55, %v909_v56  ;;  %v1168_v10 = vmax.f32 %v984_v59, 0.0  ;;  %v1188_v25 = vpack.c.bf16 %v1167_v9, %v1164_v16 }
 0x172   :  { %v914_v60 = vpop.f32.mrf.mxu0  ;;  %v989_v61 = vpop.f32.mrf.mxu1 }
 0x173   :  { %v915_v26 = vadd.f32 %v914_v60, %v5446_v46  ;;  %v990_v6 = vadd.f32 %v989_v61, %v911_v38  ;;  %v1170_v13 = vmax.f32 %v988_v17, 0.0  ;;  %v1189_v27 = vpack.c.bf16 %v1168_v10, %v1165_v19  ;;  %v4534_v10 = vld [vmem:[#allocation2 + $0x254] ss:$8 sps:$4 sm:$0xff]  }
 0x174   :  { %v918_v1 = vpop.f32.mrf.mxu0  ;;  %v991_v2 = vpop.f32.mrf.mxu1  ;;  %v1203_v41 = vrot.slane %v1188_v25, 4 }
 0x175   :  { %v992_v8 = vadd.f32 %v991_v2, %v913_v62  ;;  %v1171_v22 = vmax.f32 %v990_v6, 0.0  ;;  %v1204_v42 = vrot.slane %v1189_v27, 4  ;;  %v919_v43 = vadd.f32 %v918_v1, %v5442_v50 }
 0x176   :  { %v920_v11 = vpop.f32.mrf.mxu0  ;;  %v993_v12 = vpop.f32.mrf.mxu1 }
 0x177   :  { %v1173_v14 = vmax.f32 %v992_v8, 0.0  ;;  %v994_v15 = vadd.f32 %v993_v12, %v915_v26  ;;  %v921_v28 = vadd.f32 %v920_v11, %v5446_v46 }
 0x178   :  { %v922_v20 = vpop.f32.mrf.mxu0  ;;  %v997_v21 = vpop.f32.mrf.mxu1 }
 0x179   :  { %v5456_v23 = vpack.c.bf16 %v1173_v14, %v1170_v13  ;;  %v1174_v24 = vmax.f32 %v994_v15, 0.0  ;;  %v923_v45 = vadd.f32 %v922_v20, %v5442_v50  ;;  %v998_v62 = vadd.f32 %v997_v21, %v919_v43  ;;  %v4532_v20 = vld [vmem:[#allocation2 + $0x250] ss:$8 sps:$4 sm:$0xff]  }
 0x17a   :  { %v924_v29 = vpop.f32.mrf.mxu0  ;;  %v999_v30 = vpop.f32.mrf.mxu1 }
 0x17b   :  { %v5460_v31 = vrot.slane %v5456_v23, 4  ;;  %v5462_v32 = vpack.c.bf16 %v1174_v24, %v1171_v22  ;;  %v1000_v33 = vadd.f32 %v999_v30, %v921_v28  ;;  %v925_v36 = vadd.f32 %v924_v29, %v5446_v46  ;;  %v4540_v24 = vld [vmem:[#allocation2 + $0x244] ss:$8 sps:$4 sm:$0xff]  }
 0x17c   :  { %v928_v7 = vpop.f32.mrf.mxu0  ;;  %v1001_v34 = vpop.f32.mrf.mxu1  ;;  %v1176_v12 = vmax.f32 %v998_v62, 0.0  ;;  %v4564_v62 = vld [vmem:[#allocation2 + $0x204] ss:$8 sps:$4 sm:$0xff]  }
 0x17d   :  { %v5465_v35 = vrot.slane %v5462_v32, 4  ;;  %v929_v37 = vadd.f32 %v928_v7, %v5442_v50  ;;  %v1230_v39 = vrot.slane %v5460_v31, 4  ;;  %v1177_v53 = vmax.f32 %v1000_v33, 0.0  ;;  %v4538_v7 = vld [vmem:[#allocation2 + $0x240] ss:$8 sps:$4 sm:$0xff]  }
 0x17e   :  { %v930_v48 = vpop.f32.mrf.mxu0  ;;  %v1003_v3 = vpop.f32.mrf.mxu1  ;;  %v1002_v54 = vadd.f32 %v1001_v34, %v923_v45  ;;  %v1238_v38 = vsel %vm169_vm1, %v1188_v25, %v5460_v31 }
 0x17f   :  { %v1231_v49 = vrot.slane %v5465_v35, 4  ;;  %v931_v5 = vadd.f32 %v930_v48, %v5446_v46  ;;  %v1004_v51 = vadd.f32 %v1003_v3, %v925_v36  ;;  %v1242_v18 = vsel %vm169_vm1, %v1189_v27, %v5465_v35  ;;  %v4552_v3 = vld [vmem:[#allocation2 + $0x224] ss:$8 sps:$4 sm:$0xff]  }
 0x180   :  { %v932_v55 = vpop.f32.mrf.mxu0  ;;  %v1007_v56 = vpop.f32.mrf.mxu1  ;;  %v1250_v57 = vsel %vm169_vm1, %v1203_v41, %v1230_v39  ;;  %2477 = vmatprep.mubr.bf16.mxu0 %v1242_v18  ;;  %v1179_v6 = vmax.f32 %v1002_v54, 0.0  ;;  %v4558_v54 = vld [vmem:[#allocation2 + $0x214] ss:$8 sps:$4 sm:$0xff]  }
 0x181   :  { %v1180_v59 = vmax.f32 %v1004_v51, 0.0  ;;  %v933_v60 = vadd.f32 %v932_v55, %v5442_v50  ;;  %v1008_v61 = vadd.f32 %v1007_v56, %v929_v37  ;;  %2528 = vmatprep.mubr.bf16.mxu1 %v1250_v57  ;;  %2478 = vmatmul.mubr.bf16.vlgmr.msra.gmra.mxu0 %v1238_v38  ;;  %v5481_v0 = vsel %vm169_vm1, %v1204_v42, %v1231_v49  ;;  %v4526_v50 = vld [vmem:[#allocation2 + $0x260] ss:$8 sps:$4 sm:$0xff]   ;;  %v4546_v37 = vld [vmem:[#allocation2 + $0x234] ss:$8 sps:$4 sm:$0xff]  }
 0x182   :  { %v934_v17 = vpop.f32.mrf.mxu0  ;;  %v1009_v63 = vpop.f32.mrf.mxu1  ;;  %2548 = vmatpush1.bf16.msra.mxu0 %v4520_v52  ;;  %v5487_v21 = vpack.c.bf16 %v1179_v6, %v1176_v12  ;;  %v4544_v42 = vld [vmem:[#allocation2 + $0x230] ss:$8 sps:$4 sm:$0xff]   ;;  %v347_v51 = vsub.s32 2, %v5427_v40  ;;  %v4570_v12 = vld [vmem:[#allocation2 + $0x2f4] ss:$8 sps:$4 sm:$0xff]  }
 0x183   :  { %v5483_v1 = vpack.c.bf16 %v1180_v59, %v1177_v53  ;;  %v935_v2 = vadd.f32 %v934_v17, %v5446_v46  ;;  %v1010_v26 = vadd.f32 %v1009_v63, %v931_v5  ;;  %2549 = vmatprep.subr.bf16.mxu0 %v4528_v58  ;;  %v1182_v15 = vmax.f32 %v1008_v61, 0.0  ;;  %v4550_v5 = vld [vmem:[#allocation2 + $0x220] ss:$8 sps:$4 sm:$0xff]   ;;  %v4556_v57 = vld [vmem:[#allocation2 + $0x210] ss:$8 sps:$4 sm:$0xff]  }
 0x184   :  { %v938_v8 = vpop.f32.mrf.mxu0  ;;  %v1011_v9 = vpop.f32.mrf.mxu1  ;;  %v5496_v58 = vrot.slane %v5438_v4, %v347_v51 }
 0x185   :  { %v1012_v11 = vadd.f32 %v1011_v9, %v933_v60  ;;  %2487 = vmatprep.mubr.bf16.mxu0 %v5483_v1  ;;  %v1183_v25 = vmax.f32 %v1010_v26, 0.0  ;;  %v4562_v8 = vld [vmem:[#allocation2 + $0x200] ss:$8 sps:$4 sm:$0xff]  }
 0x186   :  { %v939_v13 = vpop.f32.mrf.mxu0  ;;  %v1013_v14 = vpop.f32.mrf.mxu1  ;;  %2550 = vmatpush1.bf16.msra.mxu0 %v4526_v50 }
 0x187   :  { %v1185_v16 = vmax.f32 %v1012_v11, 0.0  ;;  %v1014_v19 = vadd.f32 %v1013_v14, %v935_v2  ;;  %2551 = vmatprep.subr.bf16.mxu0 %v4534_v10 }
 0x188   :  { %v940_v46 = vpop.f32.mrf.mxu0  ;;  %v1017_v22 = vpop.f32.mrf.mxu1 }
 0x189   :  { %v5489_v27 = vpack.c.bf16 %v1185_v16, %v1182_v15  ;;  %v1186_v28 = vmax.f32 %v1014_v19, 0.0  ;;  %2488 = vmatmul.mubr.bf16.gmra.mxu0 %v5487_v21  ;;  %v4568_v22 = vld [vmem:[#allocation2 + $0x2f0] ss:$8 sps:$4 sm:$0xff]  }
 0x18a   :  { %v941_v29 = vpop.f32.mrf.mxu0  ;;  %v1018_v30 = vpop.f32.mrf.mxu1  ;;  %2552 = vmatpush1.bf16.msra.mxu0 %v4532_v20 }
 0x18b   :  { %v5492_v33 = vpack.c.bf16 %v1186_v28, %v1183_v25  ;;  %2553 = vmatprep.subr.bf16.mxu0 %v4540_v24  ;;  %v4576_v29 = vld [vmem:[#allocation2 + $0x2e4] ss:$8 sps:$4 sm:$0xff]  }
 0x18c   :  { %v1019_v34 = vpop.f32.mrf.mxu1  ;;  %v4123_v36 = vpop.f32.mrf.mxu0 }
 0x18e   :  { %v1020_v39 = vpop.f32.mrf.mxu1  ;;  %v4124_v41 = vpop.f32.mrf.mxu0  ;;  %2554 = vmatpush1.bf16.msra.mxu0 %v4538_v7 }
 0x18f   :  { %2555 = vmatprep.subr.bf16.mxu0 %v4546_v37  ;;  %v4125_v59 = vadd.f32 %v4124_v41, %v4123_v36 }
 0x190   :  { %v4126_v45 = vpop.f32.mrf.mxu0  ;;  %v4169_v48 = vpop.f32.mrf.mxu1 }
 0x191   :  { %v1057_v9 = vadd.f32 %v4125_v59, %v5496_v58  ;;  %v4583_v59 = vld [vmem:[#allocation2 + $0x370] ss:$8 sps:$4 sm:$0xff]  }
 0x192   :  { %v4127_v43 = vpop.f32.mrf.mxu0  ;;  %v4170_v49 = vpop.f32.mrf.mxu1  ;;  %2556 = vmatpush1.bf16.msra.mxu0 %v4544_v42  ;;  %v4574_v42 = vld [vmem:[#allocation2 + $0x2e0] ss:$8 sps:$4 sm:$0xff]  }
 0x193   :  { %2557 = vmatprep.subr.bf16.mxu0 %v4552_v3  ;;  %v4128_v55 = vadd.f32 %v4127_v43, %v4126_v45  ;;  %v4171_v63 = vadd.f32 %v4170_v49, %v4169_v48  ;;  %v4582_v49 = vld [vmem:[#allocation2 + $0x2d4] ss:$8 sps:$4 sm:$0xff]  }
 0x194   :  { %v4129_v52 = vpop.f32.mrf.mxu0  ;;  %v4172_v53 = vpop.f32.mrf.mxu1 }
 0x195   :  { %v1060_v40 = vadd.f32 %v4128_v55, %v5496_v58  ;;  %v1128_v14 = vadd.f32 %v4171_v63, %v1057_v9 }
 0x196   :  { %v4130_v56 = vpop.f32.mrf.mxu0  ;;  %v4173_v18 = vpop.f32.mrf.mxu1  ;;  %2558 = vmatpush1.bf16.msra.mxu0 %v4550_v5 }
 0x197   :  { %v4174_v60 = vadd.f32 %v4173_v18, %v4172_v53  ;;  %2559 = vmatprep.subr.bf16.mxu0 %v4558_v54  ;;  %v4131_v17 = vadd.f32 %v4130_v56, %v4129_v52  ;;  %v1166_v7 = vmax.f32 %v1128_v14, 0.0  ;;  %v4589_v14 = vld [vmem:[#allocation2 + $0x360] ss:$8 sps:$4 sm:$0xff]  }
 0x198   :  { %v4132_v61 = vpop.f32.mrf.mxu0  ;;  %v4175_v38 = vpop.f32.mrf.mxu1 }
 0x199   :  { %v1131_v4 = vadd.f32 %v4174_v60, %v1060_v40  ;;  %v1065_v13 = vadd.f32 %v4131_v17, %v5496_v58 }
 0x19a   :  { %v4133_v2 = vpop.f32.mrf.mxu0  ;;  %v4176_v26 = vpop.f32.mrf.mxu1  ;;  %2560 = vmatpush1.bf16.msra.mxu0 %v4556_v57  ;;  %v4580_v57 = vld [vmem:[#allocation2 + $0x2d0] ss:$8 sps:$4 sm:$0xff]  }
 0x19b   :  { %v4134_v50 = vadd.f32 %v4133_v2, %v4132_v61  ;;  %v4177_v6 = vadd.f32 %v4176_v26, %v4175_v38  ;;  %2561 = vmatprep.subr.bf16.mxu0 %v4564_v62  ;;  %v1169_v24 = vmax.f32 %v1131_v4, 0.0  ;;  %v4588_v62 = vld [vmem:[#allocation2 + $0x2c4] ss:$8 sps:$4 sm:$0xff]   ;;  %v5514_v4 = vrot.slane %v5487_v21, 4 }
 0x19c   :  { %v4135_v10 = vpop.f32.mrf.mxu0  ;;  %v4178_v11 = vpop.f32.mrf.mxu1 }
 0x19d   :  { %v1068_v19 = vadd.f32 %v4134_v50, %v5496_v58  ;;  %v1136_v20 = vadd.f32 %v4177_v6, %v1065_v13  ;;  %v1190_v45 = vpack.c.bf16 %v1169_v24, %v1166_v7  ;;  %v4591_v50 = vld [vmem:[#allocation2 + $0x364] ss:$8 sps:$4 sm:$0xff]   ;;  %v4592_v7 = vld [vmem:[#allocation2 + $0x2b0] ss:$8 sps:$4 sm:$0xff]  }
 0x19e   :  { %v4136_v15 = vpop.f32.mrf.mxu0  ;;  %v4179_v16 = vpop.f32.mrf.mxu1  ;;  %2562 = vmatpush1.bf16.msra.mxu0 %v4562_v8 }
 0x19f   :  { %v4180_v46 = vadd.f32 %v4179_v16, %v4178_v11  ;;  %2563 = vmatprep.subr.bf16.mxu0 %v4570_v12  ;;  %v1172_v37 = vmax.f32 %v1136_v20, 0.0  ;;  %v4137_v48 = vadd.f32 %v4136_v15, %v4135_v10  ;;  %v1205_v17 = vrot.slane %v1190_v45, 4  ;;  %v4586_v12 = vld [vmem:[#allocation2 + $0x2c0] ss:$8 sps:$4 sm:$0xff]   ;;  %v4597_v20 = vld [vmem:[#allocation2 + $0x354] ss:$8 sps:$4 sm:$0xff]  }
 0x1a0   :  { %v4138_v25 = vpop.f32.mrf.mxu0  ;;  %v4181_v28 = vpop.f32.mrf.mxu1 }
 0x1a1   :  { %v1139_v30 = vadd.f32 %v4180_v46, %v1068_v19  ;;  %v1073_v60 = vadd.f32 %v4137_v48, %v5496_v58  ;;  %v4594_v19 = vld [vmem:[#allocation2 + $0x2b4] ss:$8 sps:$4 sm:$0xff]  }
 0x1a2   :  { %v4139_v34 = vpop.f32.mrf.mxu0  ;;  %v4182_v36 = vpop.f32.mrf.mxu1  ;;  %2564 = vmatpush2.bf16.msra.mxu0 %v4568_v22 }
 0x1a3   :  { %v1175_v39 = vmax.f32 %v1139_v30, 0.0  ;;  %v4140_v41 = vadd.f32 %v4139_v34, %v4138_v25  ;;  %2565 = vmatprep.subr.bf16.mxu0 %v4576_v29  ;;  %v4183_v51 = vadd.f32 %v4182_v36, %v4181_v28  ;;  %v5520_v29 = vrot.slane %v5483_v1, 4  ;;  %v4595_v34 = vld [vmem:[#allocation2 + $0x350] ss:$8 sps:$4 sm:$0xff]  }
 0x1a4   :  { %v4141_v3 = vpop.f32.mrf.mxu0  ;;  %v4184_v43 = vpop.f32.mrf.mxu1 }
 0x1a5   :  { %v5502_v5 = vpack.c.bf16 %v1175_v39, %v1172_v37  ;;  %v1076_v55 = vadd.f32 %v4140_v41, %v5496_v58  ;;  %v1144_v6 = vadd.f32 %v4183_v51, %v1073_v60  ;;  %v4600_v37 = vld [vmem:[#allocation2 + $0x2a4] ss:$8 sps:$4 sm:$0xff]   ;;  %v1266_v1 = vsel %vm169_vm1, %v5462_v32, %v5520_v29  ;;  %v4601_v51 = vld [vmem:[#allocation2 + $0x340] ss:$8 sps:$4 sm:$0xff]  }
 0x1a6   :  { %v4142_v52 = vpop.f32.mrf.mxu0  ;;  %v4185_v53 = vpop.f32.mrf.mxu1  ;;  %2566 = vmatpush2.bf16.msra.mxu0 %v4574_v42  ;;  %v4603_v42 = vld [vmem:[#allocation2 + $0x344] ss:$8 sps:$4 sm:$0xff]   ;;  %v4610_v32 = vld [vmem:[#allocation2 + $0x280] ss:$8 sps:$4 sm:$0xff]  }
 0x1a7   :  { %v5505_v54 = vrot.slane %v5502_v5, 4  ;;  %v4143_v56 = vadd.f32 %v4142_v52, %v4141_v3  ;;  %v4186_v18 = vadd.f32 %v4185_v53, %v4184_v43  ;;  %2567 = vmatprep.subr.bf16.mxu0 %v4582_v49  ;;  %v1178_v24 = vmax.f32 %v1144_v6, 0.0  ;;  %v4598_v49 = vld [vmem:[#allocation2 + $0x2a0] ss:$8 sps:$4 sm:$0xff]   ;;  %v4606_v52 = vld [vmem:[#allocation2 + $0x294] ss:$8 sps:$4 sm:$0xff]  }
 0x1a8   :  { %v4144_v61 = vpop.f32.mrf.mxu0  ;;  %v4187_v38 = vpop.f32.mrf.mxu1  ;;  %v4609_v53 = vld [vmem:[#allocation2 + $0x334] ss:$8 sps:$4 sm:$0xff]   ;;  %v4612_v60 = vld [vmem:[#allocation2 + $0x284] ss:$8 sps:$4 sm:$0xff]   ;;  %v4622_v6 = vld [vmem:[#allocation2 + $0x460] ss:$8 sps:$4 sm:$0xff]  }
 0x1a9   :  { %v1081_v40 = vadd.f32 %v4143_v56, %v5496_v58  ;;  %v1147_v63 = vadd.f32 %v4186_v18, %v1076_v55  ;;  %v1246_v2 = vsel %vm169_vm1, %v1190_v45, %v5505_v54  ;;  %v1232_v26 = vrot.slane %v5505_v54, 4 }
 0x1aa   :  { %v4145_v8 = vpop.f32.mrf.mxu0  ;;  %v4188_v9 = vpop.f32.mrf.mxu1  ;;  %2529 = vmatmul.mubr.bf16.vlgmr.msra.gmra.mxu1 %v1246_v2  ;;  %2568 = vmatpush2.bf16.msra.mxu0 %v4580_v57  ;;  %v4604_v57 = vld [vmem:[#allocation2 + $0x290] ss:$8 sps:$4 sm:$0xff]   ;;  %v4624_v2 = vld [vmem:[#allocation2 + $0x464] ss:$8 sps:$4 sm:$0xff]  }
 0x1ab   :  { %v4146_v10 = vadd.f32 %v4145_v8, %v4144_v61  ;;  %v4189_v11 = vadd.f32 %v4188_v9, %v4187_v38  ;;  %2599 = vmatpush1.bf16.msra.mxu1 %v4583_v59  ;;  %v1258_v13 = vsel %vm169_vm1, %v1205_v17, %v1232_v26  ;;  %v1181_v15 = vmax.f32 %v1147_v63, 0.0  ;;  %2538 = vmatprep.mubr.bf16.mxu1 %v5514_v4  ;;  %v4607_v59 = vld [vmem:[#allocation2 + $0x330] ss:$8 sps:$4 sm:$0xff]   ;;  %v4615_v61 = vld [vmem:[#allocation2 + $0x324] ss:$8 sps:$4 sm:$0xff]  }
 0x1ac   :  { %v4190_v16 = vpop.f32.mrf.mxu1  ;;  %2569 = vmatprep.subr.bf16.mxu0 %v4588_v62  ;;  %v4147_v46 = vpop.f32.mrf.mxu0  ;;  %2579 = vmatprep.mubr.bf16.mxu0 %v1258_v13  ;;  %v4613_v38 = vld [vmem:[#allocation2 + $0x320] ss:$8 sps:$4 sm:$0xff]   ;;  %v4618_v62 = vld [vmem:[#allocation2 + $0x474] ss:$8 sps:$4 sm:$0xff]   ;;  %v4619_v63 = vld [vmem:[#allocation2 + $0x310] ss:$8 sps:$4 sm:$0xff]  }
 0x1ad   :  { %v1084_v22 = vadd.f32 %v4146_v10, %v5496_v58  ;;  %v1152_v21 = vadd.f32 %v4189_v11, %v1081_v40  ;;  %2600 = vmatprep.subr.bf16.mxu1 %v4591_v50  ;;  %v1196_v36 = vpack.c.bf16 %v1181_v15, %v1178_v24  ;;  %v4621_v17 = vld [vmem:[#allocation2 + $0x314] ss:$8 sps:$4 sm:$0xff]   ;;  %v4616_v40 = vld [vmem:[#allocation2 + $0x470] ss:$8 sps:$4 sm:$0xff]   ;;  %v4627_v50 = vld [vmem:[#allocation2 + $0x304] ss:$8 sps:$4 sm:$0xff]  }
 0x1ae   :  { %v4191_v25 = vpop.f32.mrf.mxu1  ;;  %v4148_v28 = vpop.f32.mrf.mxu0  ;;  %2570 = vmatpush2.bf16.msra.mxu0 %v4586_v12  ;;  %v4625_v8 = vld [vmem:[#allocation2 + $0x300] ss:$8 sps:$4 sm:$0xff]   ;;  %v4630_v9 = vld [vmem:[#allocation2 + $0x454] ss:$8 sps:$4 sm:$0xff]   ;;  %v1233_v11 = vrot.slane %v5514_v4, 4 }
 0x1af   :  { %v4192_v30 = vadd.f32 %v4191_v25, %v4190_v16  ;;  %2601 = vmatpush1.bf16.msra.mxu1 %v4589_v14  ;;  %2571 = vmatprep.subr.bf16.mxu0 %v4594_v19  ;;  %v1184_v3 = vmax.f32 %v1152_v21, 0.0  ;;  %v5527_v26 = vrot.slane %v1196_v36, 4  ;;  %v4633_v10 = vld [vmem:[#allocation2 + $0x3f4] ss:$8 sps:$4 sm:$0xff]   ;;  %v4628_v12 = vld [vmem:[#allocation2 + $0x450] ss:$8 sps:$4 sm:$0xff]  }
 0x1b0   :  { %2602 = vmatprep.subr.bf16.mxu1 %v4597_v20  ;;  %v4150_v39 = vpop.f32.mrf.mxu0  ;;  %v4193_v58 = vpop.f32.mrf.mxu1  ;;  %v4631_v13 = vld [vmem:[#allocation2 + $0x3f0] ss:$8 sps:$4 sm:$0xff]   ;;  %v4636_v14 = vld [vmem:[#allocation2 + $0x444] ss:$8 sps:$4 sm:$0xff]   ;;  %v1273_v15 = vsel %vm169_vm1, %v5460_v31, %v1233_v11  ;;  %v4634_v16 = vld [vmem:[#allocation2 + $0x440] ss:$8 sps:$4 sm:$0xff]  }
 0x1b1   :  { %v1155_v41 = vadd.f32 %v4192_v30, %v1084_v22  ;;  %v4637_v19 = vld [vmem:[#allocation2 + $0x3e0] ss:$8 sps:$4 sm:$0xff]   ;;  %v4642_v20 = vld [vmem:[#allocation2 + $0x434] ss:$8 sps:$4 sm:$0xff]   ;;  %v4640_v22 = vld [vmem:[#allocation2 + $0x430] ss:$8 sps:$4 sm:$0xff]  }
 0x1b2   :  { %2539 = vmatmul.mubr.bf16.gmra.mxu1 %v1196_v36  ;;  %v4151_v45 = vpop.f32.mrf.mxu0  ;;  %v4194_v48 = vpop.f32.mrf.mxu1  ;;  %2572 = vmatpush2.bf16.msra.mxu0 %v4592_v7  ;;  %v4645_v46 = vld [vmem:[#allocation2 + $0x3d4] ss:$8 sps:$4 sm:$0xff]   ;;  %v4643_v21 = vld [vmem:[#allocation2 + $0x3d0] ss:$8 sps:$4 sm:$0xff]   ;;  %v4648_v24 = vld [vmem:[#allocation2 + $0x424] ss:$8 sps:$4 sm:$0xff]  }
 0x1b3   :  { %v1187_v43 = vmax.f32 %v1155_v41, 0.0  ;;  %2603 = vmatpush1.bf16.msra.mxu1 %v4595_v34  ;;  %2630 = vmatprep.mubr.bf16.mxu1 %v1266_v1  ;;  %v4651_v25 = vld [vmem:[#allocation2 + $0x3c4] ss:$8 sps:$4 sm:$0xff]   ;;  %v4646_v28 = vld [vmem:[#allocation2 + $0x420] ss:$8 sps:$4 sm:$0xff]  }
 0x1b4   :  { %2573 = vmatprep.subr.bf16.mxu0 %v4600_v37  ;;  %v4196_v55 = vpop.f32.mrf.mxu1  ;;  %2604 = vmatprep.subr.bf16.mxu1 %v4603_v42  ;;  %v4649_v31 = vld [vmem:[#allocation2 + $0x3c0] ss:$8 sps:$4 sm:$0xff]   ;;  %v4654_v30 = vld [vmem:[#allocation2 + $0x414] ss:$8 sps:$4 sm:$0xff]   ;;  %v4652_v34 = vld [vmem:[#allocation2 + $0x410] ss:$8 sps:$4 sm:$0xff]  }
 0x1b5   :  { %v5525_v56 = vpack.c.bf16 %v1187_v43, %v1184_v3  ;;  %v4657_v7 = vld [vmem:[#allocation2 + $0x3b4] ss:$8 sps:$4 sm:$0xff]   ;;  %v4655_v36 = vld [vmem:[#allocation2 + $0x3b0] ss:$8 sps:$4 sm:$0xff]   ;;  %v4660_v37 = vld [vmem:[#allocation2 + $0x404] ss:$8 sps:$4 sm:$0xff]  }
 0x1b6   :  { %v4197_v18 = vpop.f32.mrf.mxu1  ;;  %2574 = vmatpush2.bf16.msra.mxu0 %v4598_v49  ;;  %v4663_v39 = vld [vmem:[#allocation2 + $0x3a4] ss:$8 sps:$4 sm:$0xff]   ;;  %v4658_v58 = vld [vmem:[#allocation2 + $0x400] ss:$8 sps:$4 sm:$0xff]   ;;  %v4666_v42 = vld [vmem:[#allocation2 + $0x4f4] ss:$8 sps:$4 sm:$0xff]  }
 0x1b7   :  { %2605 = vmatpush1.bf16.msra.mxu1 %v4601_v51  ;;  %2575 = vmatprep.subr.bf16.mxu0 %v4606_v52  ;;  %v4661_v41 = vld [vmem:[#allocation2 + $0x3a0] ss:$8 sps:$4 sm:$0xff]   ;;  %v4669_v45 = vld [vmem:[#allocation2 + $0x394] ss:$8 sps:$4 sm:$0xff]   ;;  %v4664_v48 = vld [vmem:[#allocation2 + $0x4f0] ss:$8 sps:$4 sm:$0xff]  }
 0x1b8   :  { %2606 = vmatprep.subr.bf16.mxu1 %v4609_v53  ;;  %v4667_v3 = vld [vmem:[#allocation2 + $0x390] ss:$8 sps:$4 sm:$0xff]   ;;  %v4672_v43 = vld [vmem:[#allocation2 + $0x4e4] ss:$8 sps:$4 sm:$0xff]   ;;  %v4670_v49 = vld [vmem:[#allocation2 + $0x4e0] ss:$8 sps:$4 sm:$0xff]  }
 0x1b9   :  { %v4675_v1 = vld [vmem:[#allocation2 + $0x384] ss:$8 sps:$4 sm:$0xff]   ;;  %v4673_v51 = vld [vmem:[#allocation2 + $0x380] ss:$8 sps:$4 sm:$0xff]   ;;  %v4678_v52 = vld [vmem:[#allocation2 + $0x4d4] ss:$8 sps:$4 sm:$0xff]  }
 0x1ba   :  { %2576 = vmatpush2.bf16.msra.mxu0 %v4604_v57  ;;  %v4681_v53 = vld [vmem:[#allocation2 + $0x574] ss:$8 sps:$4 sm:$0xff]   ;;  %v4676_v55 = vld [vmem:[#allocation2 + $0x4d0] ss:$8 sps:$4 sm:$0xff]   ;;  %v4684_v57 = vld [vmem:[#allocation2 + $0x4c4] ss:$8 sps:$4 sm:$0xff]  }
 0x1bb   :  { %2607 = vmatpush1.bf16.msra.mxu1 %v4607_v59  ;;  %2577 = vmatprep.subr.bf16.mxu0 %v4612_v60  ;;  %v4679_v18 = vld [vmem:[#allocation2 + $0x570] ss:$8 sps:$4 sm:$0xff]   ;;  %v4687_v59 = vld [vmem:[#allocation2 + $0x564] ss:$8 sps:$4 sm:$0xff]   ;;  %v1262_v60 = vsel %vm169_vm1, %v5456_v23, %v5514_v4 }
 0x1bc   :  { %2608 = vmatprep.subr.bf16.mxu1 %v4615_v61  ;;  %v4682_v61 = vld [vmem:[#allocation2 + $0x4c0] ss:$8 sps:$4 sm:$0xff]   ;;  %v4696_v23 = vld [vmem:[#allocation2 + $0x4a4] ss:$8 sps:$4 sm:$0xff]   ;;  %v4703_v11 = vld [vmem:[#allocation2 + $0x530] ss:$8 sps:$4 sm:$0xff]  }
 0x1bd   :  { %v4699_v4 = vld [vmem:[#allocation2 + $0x544] ss:$8 sps:$4 sm:$0xff]  }
 0x1be   :  { %2578 = vmatpush2.bf16.msra.mxu0 %v4610_v32  ;;  %v4685_v32 = vld [vmem:[#allocation2 + $0x560] ss:$8 sps:$4 sm:$0xff]  }
 0x1bf   :  { %2609 = vmatpush1.bf16.msra.mxu1 %v4613_v38  ;;  %2649 = vmatprep.subr.bf16.mxu0 %v4618_v62  ;;  %v4690_v38 = vld [vmem:[#allocation2 + $0x4b4] ss:$8 sps:$4 sm:$0xff]  }
 0x1c0   :  { %2610 = vmatprep.subr.bf16.mxu1 %v4621_v17  ;;  %v4693_v62 = vld [vmem:[#allocation2 + $0x554] ss:$8 sps:$4 sm:$0xff]   ;;  %v4688_v17 = vld [vmem:[#allocation2 + $0x4b0] ss:$8 sps:$4 sm:$0xff]  }
 0x1c1   :  { %2580 = vmatmul.mubr.bf16.vlgmr.msra.gmra.mxu0 %v5481_v0  ;;  %v4639_v0 = vld [vmem:[#allocation2 + $0x3e4] ss:$8 sps:$4 sm:$0xff]  }
 0x1c2   :  { %2589 = vmatprep.mubr.bf16.mxu0 %v5527_v26  ;;  %2650 = vmatpush1.bf16.msra.mxu0 %v4616_v40  ;;  %v1235_v40 = vrot.slane %v5527_v26, 4 }
 0x1c3   :  { %2611 = vmatpush1.bf16.msra.mxu1 %v4619_v63  ;;  %2651 = vmatprep.subr.bf16.mxu0 %v4624_v2  ;;  %v4691_v63 = vld [vmem:[#allocation2 + $0x550] ss:$8 sps:$4 sm:$0xff]  }
 0x1c4   :  { %2612 = vmatprep.subr.bf16.mxu1 %v4627_v50  ;;  %v1279_v2 = vsel %vm169_vm1, %v5505_v54, %v1235_v40  ;;  %v4694_v50 = vld [vmem:[#allocation2 + $0x4a0] ss:$8 sps:$4 sm:$0xff]  }
 0x1c5   :  { %v4709_v54 = vld [vmem:[#allocation2 + $0x520] ss:$8 sps:$4 sm:$0xff]  }
 0x1c6   :  { %2652 = vmatpush1.bf16.msra.mxu0 %v4622_v6  ;;  %v4697_v6 = vld [vmem:[#allocation2 + $0x540] ss:$8 sps:$4 sm:$0xff]  }
 0x1c7   :  { %2613 = vmatpush1.bf16.msra.mxu1 %v4625_v8  ;;  %2653 = vmatprep.subr.bf16.mxu0 %v4630_v9  ;;  %v4702_v8 = vld [vmem:[#allocation2 + $0x494] ss:$8 sps:$4 sm:$0xff]   ;;  %v4756_v40 = vld [vmem:[%s5760_s5 + $0xe0] sm:$0xff]  }
 0x1c8   :  { %2614 = vmatprep.subr.bf16.mxu1 %v4633_v10  ;;  %v4705_v9 = vld [vmem:[#allocation2 + $0x534] ss:$8 sps:$4 sm:$0xff]   ;;  %v4700_v10 = vld [vmem:[#allocation2 + $0x490] ss:$8 sps:$4 sm:$0xff]  }
 0x1c9   :  { %2590 = vmatmul.mubr.bf16.gmra.mxu0 %v5520_v29 }
 0x1ca   :  { %2654 = vmatpush1.bf16.msra.mxu0 %v4628_v12  ;;  %2681 = vmatprep.mubr.bf16.mxu0 %v1273_v15  ;;  %v4708_v12 = vld [vmem:[#allocation2 + $0x484] ss:$8 sps:$4 sm:$0xff]   ;;  %v4712_v15 = vld [vmem:[#allocation2 + $0x510] ss:$8 sps:$4 sm:$0xff]  }
 0x1cb   :  { %2615 = vmatpush2.bf16.msra.mxu1 %v4631_v13  ;;  %2655 = vmatprep.subr.bf16.mxu0 %v4636_v14  ;;  %v4711_v13 = vld [vmem:[#allocation2 + $0x524] ss:$8 sps:$4 sm:$0xff]   ;;  %v4706_v14 = vld [vmem:[#allocation2 + $0x480] ss:$8 sps:$4 sm:$0xff]  }
 0x1cc   :  { %2616 = vmatprep.subr.bf16.mxu1 %v4639_v0  ;;  %v4714_v0 = vld [vmem:[#allocation2 + $0x514] ss:$8 sps:$4 sm:$0xff]  }
 0x1ce   :  { %2656 = vmatpush1.bf16.msra.mxu0 %v4634_v16  ;;  %v1270_v16 = vsel %vm169_vm1, %v5502_v5, %v5527_v26  ;;  %v4726_v5 = vld [vmem:[#allocation2 + $0x5d4] ss:$8 sps:$4 sm:$0xff]   ;;  %v4729_v26 = vld [vmem:[#allocation2 + $0x5c4] ss:$8 sps:$4 sm:$0xff]  }
 0x1cf   :  { %2617 = vmatpush2.bf16.msra.mxu1 %v4637_v19  ;;  %2657 = vmatprep.subr.bf16.mxu0 %v4642_v20  ;;  %v1224_v19 = vrot.slane %v5489_v27, 4  ;;  %v4717_v20 = vld [vmem:[#allocation2 + $0x504] ss:$8 sps:$4 sm:$0xff]  }
 0x1d0   :  { %2618 = vmatprep.subr.bf16.mxu1 %v4645_v46  ;;  %v4715_v46 = vld [vmem:[#allocation2 + $0x500] ss:$8 sps:$4 sm:$0xff]  }
 0x1d2   :  { %2658 = vmatpush1.bf16.msra.mxu0 %v4640_v22  ;;  %v4720_v22 = vld [vmem:[#allocation2 + $0x5f4] ss:$8 sps:$4 sm:$0xff]  }
 0x1d3   :  { %2619 = vmatpush2.bf16.msra.mxu1 %v4643_v21  ;;  %2659 = vmatprep.subr.bf16.mxu0 %v4648_v24  ;;  %v4718_v21 = vld [vmem:[#allocation2 + $0x5f0] ss:$8 sps:$4 sm:$0xff]   ;;  %v4723_v24 = vld [vmem:[#allocation2 + $0x5e4] ss:$8 sps:$4 sm:$0xff]  }
 0x1d4   :  { %2620 = vmatprep.subr.bf16.mxu1 %v4651_v25  ;;  %v4721_v25 = vld [vmem:[#allocation2 + $0x5e0] ss:$8 sps:$4 sm:$0xff]  }
 0x1d6   :  { %2660 = vmatpush1.bf16.msra.mxu0 %v4646_v28  ;;  %v4727_v28 = vld [vmem:[#allocation2 + $0x5c0] ss:$8 sps:$4 sm:$0xff]  }
 0x1d7   :  { %2621 = vmatpush2.bf16.msra.mxu1 %v4649_v31  ;;  %2661 = vmatprep.subr.bf16.mxu0 %v4654_v30  ;;  %v4732_v31 = vld [vmem:[#allocation2 + $0x5b4] ss:$8 sps:$4 sm:$0xff]   ;;  %v4730_v30 = vld [vmem:[#allocation2 + $0x5b0] ss:$8 sps:$4 sm:$0xff]  }
 0x1d8   :  { %2622 = vmatprep.subr.bf16.mxu1 %v4657_v7  ;;  %v4735_v7 = vld [vmem:[#allocation2 + $0x5a4] ss:$8 sps:$4 sm:$0xff]  }
 0x1da   :  { %2662 = vmatpush1.bf16.msra.mxu0 %v4652_v34  ;;  %v4733_v34 = vld [vmem:[#allocation2 + $0x5a0] ss:$8 sps:$4 sm:$0xff]  }
 0x1db   :  { %2623 = vmatpush2.bf16.msra.mxu1 %v4655_v36  ;;  %2663 = vmatprep.subr.bf16.mxu0 %v4660_v37  ;;  %v4738_v36 = vld [vmem:[#allocation2 + $0x594] ss:$8 sps:$4 sm:$0xff]   ;;  %v4736_v37 = vld [vmem:[#allocation2 + $0x590] ss:$8 sps:$4 sm:$0xff]  }
 0x1dc   :  { %2624 = vmatprep.subr.bf16.mxu1 %v4663_v39  ;;  %v4741_v39 = vld [vmem:[#allocation2 + $0x584] ss:$8 sps:$4 sm:$0xff]  }
 0x1de   :  { %2664 = vmatpush1.bf16.msra.mxu0 %v4658_v58  ;;  %v4739_v58 = vld [vmem:[#allocation2 + $0x580] ss:$8 sps:$4 sm:$0xff]  }
 0x1df   :  { %2625 = vmatpush2.bf16.msra.mxu1 %v4661_v41  ;;  %2665 = vmatprep.subr.bf16.mxu0 %v4666_v42  ;;  %v1234_v41 = vrot.slane %v5520_v29, 4 }
 0x1e0   :  { %2626 = vmatprep.subr.bf16.mxu1 %v4669_v45  ;;  %v1226_v45 = vrot.slane %v5525_v56, 4 }
 0x1e1   :  { %v1276_v42 = vsel %vm169_vm1, %v5465_v35, %v1234_v41  ;;  %v4742_v35 = vld [vmem:[%s5760_s5 + $0x78] sm:$0xff]  }
 0x1e2   :  { %2666 = vmatpush2.bf16.msra.mxu0 %v4664_v48  ;;  %v1225_v48 = vrot.slane %v5492_v33, 4 }
 0x1e3   :  { %2627 = vmatpush2.bf16.msra.mxu1 %v4667_v3  ;;  %2667 = vmatprep.subr.bf16.mxu0 %v4672_v43 }
 0x1e4   :  { %2628 = vmatprep.subr.bf16.mxu1 %v4675_v1 }
 0x1e6   :  { %2668 = vmatpush2.bf16.msra.mxu0 %v4670_v49 }
 0x1e7   :  { %2629 = vmatpush2.bf16.msra.mxu1 %v4673_v51  ;;  %2669 = vmatprep.subr.bf16.mxu0 %v4678_v52 }
 0x1e8   :  { %2700 = vmatprep.subr.bf16.mxu1 %v4681_v53 }
 0x1ea   :  { %2631 = vmatmul.mubr.bf16.vlgmr.msra.gmra.mxu1 %v1262_v60  ;;  %2670 = vmatpush2.bf16.msra.mxu0 %v4676_v55  ;;  %v4745_v55 = vld [vmem:[%s5760_s5 + $0x70] sm:$0xff]  }
 0x1eb   :  { %2640 = vmatprep.mubr.bf16.mxu1 %v5492_v33  ;;  %2701 = vmatpush1.bf16.msra.mxu1 %v4679_v18  ;;  %v4743_v33 = vld [vmem:[%s5760_s5 + $0x38] sm:$0xff]   ;;  %v4750_v60 = vld [vmem:[%s5760_s5 + $0xb0] sm:$0xff]  }
 0x1ec   :  { %2671 = vmatprep.subr.bf16.mxu0 %v4684_v57  ;;  %2702 = vmatprep.subr.bf16.mxu1 %v4687_v59  ;;  %v4746_v18 = vld [vmem:[%s5760_s5 + $0xb8] sm:$0xff]   ;;  %v4748_v57 = vld [vmem:[%s5760_s5 + $0xf0] sm:$0xff]  }
 0x1ed   :  { %v4747_v59 = vld [vmem:[%s5760_s5 + $0x30] sm:$0xff]  }
 0x1ee   :  { %2672 = vmatpush2.bf16.msra.mxu0 %v4682_v61  ;;  %v4749_v61 = vld [vmem:[%s5760_s5 + $0x68] sm:$0xff]  }
 0x1ef   :  { %2703 = vmatpush1.bf16.msra.mxu1 %v4685_v32  ;;  %2673 = vmatprep.subr.bf16.mxu0 %v4690_v38  ;;  %v4752_v32 = vld [vmem:[%s5760_s5 + $0xe8] sm:$0xff]  }
 0x1f0   :  { %2704 = vmatprep.subr.bf16.mxu1 %v4693_v62  ;;  %v4751_v38 = vld [vmem:[%s5760_s5 + $0x28] sm:$0xff]  }
 0x1f1   :  { %v4754_v62 = vld [vmem:[%s5760_s5 + $0xa8] sm:$0xff]  }
 0x1f2   :  { %2641 = vmatmul.mubr.bf16.gmra.mxu1 %v5489_v27  ;;  %2674 = vmatpush2.bf16.msra.mxu0 %v4688_v17  ;;  %v4724_v27 = vld [vmem:[#allocation2 + $0x5d0] ss:$8 sps:$4 sm:$0xff]   ;;  %v4753_v17 = vld [vmem:[%s5760_s5 + $0x60] sm:$0xff]  }
 0x1f3   :  { %2705 = vmatpush1.bf16.msra.mxu1 %v4691_v63  ;;  %2732 = vmatprep.mubr.bf16.mxu1 %v1279_v2  ;;  %v4755_v63 = vld [vmem:[%s5760_s5 + $0x20] sm:$0xff]   ;;  %v4759_v2 = vld [vmem:[%s5760_s5 + $0x18] sm:$0xff]  }
 0x1f4   :  { %2675 = vmatprep.subr.bf16.mxu0 %v4696_v23  ;;  %2706 = vmatprep.subr.bf16.mxu1 %v4699_v4  ;;  %v4758_v23 = vld [vmem:[%s5760_s5 + $0xa0] sm:$0xff]   ;;  %v4757_v4 = vld [vmem:[%s5760_s5 + $0x58] sm:$0xff]  }
 0x1f6   :  { %2676 = vmatpush2.bf16.msra.mxu0 %v4694_v50  ;;  %v1473_v50 = vld [vmem:[%s5759_s4] sm:$0x3] }
 0x1f7   :  { %2707 = vmatpush1.bf16.msra.mxu1 %v4697_v6  ;;  %2677 = vmatprep.subr.bf16.mxu0 %v4702_v8  ;;  %v1478_v6 = vrot.slane %v1473_v50, %v5430_v47  ;;  %v1482_v8 = vrot.slane %v1473_v50, %v5433_v44 }
 0x1f8   :  { %2708 = vmatprep.subr.bf16.mxu1 %v4705_v9 }
 0x1fa   :  { %2678 = vmatpush2.bf16.msra.mxu0 %v4700_v10  ;;  %v4760_v10 = vld [vmem:[%s5760_s5 + $0xd8] sm:$0xff]  }
 0x1fb   :  { %2709 = vmatpush1.bf16.msra.mxu1 %v4703_v11  ;;  %2679 = vmatprep.subr.bf16.mxu0 %v4708_v12  ;;  %v4761_v12 = vld [vmem:[%s5760_s5 + $0x50] sm:$0xff]  }
 0x1fc   :  { %2710 = vmatprep.subr.bf16.mxu1 %v4711_v13  ;;  %v4762_v13 = vld [vmem:[%s5760_s5 + $0x98] sm:$0xff]  }
 0x1fe   :  { %2680 = vmatpush2.bf16.msra.mxu0 %v4706_v14 }
 0x1ff   :  { %2711 = vmatpush1.bf16.msra.mxu1 %v4709_v54  ;;  %4199 = vmatprep.subr.bf16.mxu0 %v4742_v35 }
 0x200   :  { %2712 = vmatprep.subr.bf16.mxu1 %v4714_v0  ;;  %v4763_v0 = vld [vmem:[%s5760_s5 + $0x10] sm:$0xff]  }
 0x201   :  { %2682 = vmatmul.mubr.bf16.vlgmr.msra.gmra.mxu0 %v1270_v16 }
 0x202   :  { %2691 = vmatprep.mubr.bf16.mxu0 %v1224_v19  ;;  %4200 = vmatpush3.bf16.msra.mxu0 %v4743_v33 }
 0x203   :  { %2713 = vmatpush1.bf16.msra.mxu1 %v4712_v15  ;;  %4201 = vmatprep.subr.bf16.mxu0 %v4745_v55 }
 0x204   :  { %2714 = vmatprep.subr.bf16.mxu1 %v4717_v20  ;;  %v4764_v20 = vld [vmem:[%s5760_s5 + $0xd0] sm:$0xff]  }
 0x206   :  { %4202 = vmatpush3.bf16.msra.mxu0 %v4747_v59 }
 0x207   :  { %2715 = vmatpush1.bf16.msra.mxu1 %v4715_v46  ;;  %4203 = vmatprep.subr.bf16.mxu0 %v4749_v61 }
 0x208   :  { %2716 = vmatprep.subr.bf16.mxu1 %v4720_v22  ;;  %v4765_v22 = vld [vmem:[%s5760_s5 + $0x48] sm:$0xff]  }
 0x209   :  { %2692 = vmatmul.mubr.bf16.gmra.mxu0 %v5525_v56  ;;  %v4744_v56 = vld [vmem:[%s5760_s5 + $0xf8] sm:$0xff]  }
 0x20a   :  { %4204 = vmatpush3.bf16.msra.mxu0 %v4751_v38 }
 0x20b   :  { %2717 = vmatpush2.bf16.msra.mxu1 %v4718_v21  ;;  %4205 = vmatprep.subr.bf16.mxu0 %v4753_v17  ;;  %v4766_v21 = vld [vmem:[%s5760_s5 + $0x90] sm:$0xff]  }
 0x20c   :  { %2718 = vmatprep.subr.bf16.mxu1 %v4723_v24 }
 0x20e   :  { %4206 = vmatpush3.bf16.msra.mxu0 %v4755_v63 }
 0x20f   :  { %2719 = vmatpush2.bf16.msra.mxu1 %v4721_v25  ;;  %4207 = vmatprep.subr.bf16.mxu0 %v4757_v4 }
 0x210   :  { %2720 = vmatprep.subr.bf16.mxu1 %v4726_v5  ;;  %v4767_v5 = vld [vmem:[%s5760_s5 + $0x8] sm:$0xff]  }
 0x212   :  { %4208 = vmatpush3.bf16.msra.mxu0 %v4759_v2 }
 0x213   :  { %2721 = vmatpush2.bf16.msra.mxu1 %v4724_v27  ;;  %4209 = vmatprep.subr.bf16.mxu0 %v4761_v12 }
 0x214   :  { %2722 = vmatprep.subr.bf16.mxu1 %v4729_v26 }
 0x216   :  { %4210 = vmatpush3.bf16.msra.mxu0 %v4763_v0 }
 0x217   :  { %2723 = vmatpush2.bf16.msra.mxu1 %v4727_v28  ;;  %4211 = vmatprep.subr.bf16.mxu0 %v4765_v22 }
 0x218   :  { %2724 = vmatprep.subr.bf16.mxu1 %v4732_v31  ;;  %v4768_v31 = vld [vmem:[%s5760_s5 + $0xc8] sm:$0xff]  }
 0x21a   :  { %4212 = vmatpush3.bf16.msra.mxu0 %v4767_v5 }
 0x21b   :  { %2725 = vmatpush2.bf16.msra.mxu1 %v4730_v30 }
 0x21c   :  { %2726 = vmatprep.subr.bf16.mxu1 %v4735_v7  ;;  %v4769_v7 = vld [vmem:[%s5760_s5 + $0x40] sm:$0xff]  }
 0x21d   :  { %4213 = vmatprep.subr.bf16.mxu0 %v4769_v7 }
 0x21f   :  { %2727 = vmatpush2.bf16.msra.mxu1 %v4733_v34  ;;  %v4770_v34 = vld [vmem:[%s5760_s5 + $0x88] sm:$0xff]  }
 0x220   :  { %2728 = vmatprep.subr.bf16.mxu1 %v4738_v36 }
 0x223   :  { %2729 = vmatpush2.bf16.msra.mxu1 %v4736_v37 }
 0x224   :  { %2730 = vmatprep.subr.bf16.mxu1 %v4741_v39  ;;  %v4771_v39 = vld [vmem:[%s5760_s5] sm:$0xff]  }
 0x225   :  { %4214 = vmatpush3.bf16.msra.mxu0 %v4771_v39 }
 0x227   :  { %2731 = vmatpush2.bf16.msra.mxu1 %v4739_v58 }
 0x228   :  { %4221 = vmatprep.subr.bf16.mxu1 %v4744_v56 }
 0x22a   :  { %2733 = vmatmul.mubr.bf16.vlgmr.msra.gmra.mxu1 %v1276_v42  ;;  %v4772_v42 = vld [vmem:[%s5760_s5 + $0xc0] sm:$0xff]  }
 0x22b   :  { %2742 = vmatprep.mubr.bf16.mxu1 %v1226_v45  ;;  %4222 = vmatpush3.bf16.msra.mxu1 %v4746_v18 }
 0x22c   :  { %4223 = vmatprep.subr.bf16.mxu1 %v4748_v57 }
 0x22f   :  { %4224 = vmatpush3.bf16.msra.mxu1 %v4750_v60 }
 0x230   :  { %4225 = vmatprep.subr.bf16.mxu1 %v4752_v32 }
 0x232   :  { %2743 = vmatmul.mubr.bf16.gmra.mxu1 %v1225_v48  ;;  %v4773_v48 = vld [vmem:[%s5760_s5 + $0x80] sm:$0xff]  }
 0x233   :  { %4226 = vmatpush3.bf16.msra.mxu1 %v4754_v62 }
 0x234   :  { %4227 = vmatprep.subr.bf16.mxu1 %v4756_v40 }
 0x237   :  { %4228 = vmatpush3.bf16.msra.mxu1 %v4758_v23 }
 0x238   :  { %4229 = vmatprep.subr.bf16.mxu1 %v4760_v10 }
 0x23b   :  { %4230 = vmatpush3.bf16.msra.mxu1 %v4762_v13 }
 0x23c   :  { %4231 = vmatprep.subr.bf16.mxu1 %v4764_v20 }
 0x23f   :  { %4232 = vmatpush3.bf16.msra.mxu1 %v4766_v21 }
 0x240   :  { %4233 = vmatprep.subr.bf16.mxu1 %v4768_v31 }
 0x241   :  { %v2479_v3 = vpop.f32.mrf.mxu0 }
 0x242   :  { %v2480_v9 = vadd.f32 %v2479_v3, %v1478_v6  ;;  %v4774_v3 = vld [vmem:[%s5760_s5 + $0x178] sm:$0xff]  }
 0x243   :  { %v2481_v43 = vpop.f32.mrf.mxu0  ;;  %4234 = vmatpush3.bf16.msra.mxu1 %v4770_v34  ;;  %4243 = vmatprep.subr.bf16.mxu0 %v4774_v3 }
 0x244   :  { %v2482_v14 = vadd.f32 %v2481_v43, %v1482_v8  ;;  %4235 = vmatprep.subr.bf16.mxu1 %v4772_v42 }
 0x245   :  { %v2483_v1 = vpop.f32.mrf.mxu0 }
 0x246   :  { %v2484_v16 = vadd.f32 %v2483_v1, %v1478_v6 }
 0x247   :  { %v5553_v49 = vpop.f32.mrf.mxu0  ;;  %4236 = vmatpush3.bf16.msra.mxu1 %v4773_v48  ;;  %v4775_v48 = vld [vmem:[%s5760_s5 + $0x138] sm:$0xff]  }
 0x248   :  { %v2486_v24 = vadd.f32 %v5553_v49, %v1482_v8 }
 0x249   :  { %v5555_v51 = vpop.f32.mrf.mxu0 }
 0x24a   :  { %v2490_v26 = vadd.f32 %v5555_v51, %v1478_v6 }
 0x24b   :  { %v5557_v52 = vpop.f32.mrf.mxu0 }
 0x24c   :  { %v2492_v36 = vadd.f32 %v5557_v52, %v1482_v8 }
 0x24d   :  { %v2493_v29 = vpop.f32.mrf.mxu0 }
 0x24f   :  { %v2494_v53 = vpop.f32.mrf.mxu0 }
 0x26a   :  { %v2530_v11 = vpop.f32.mrf.mxu1 }
 0x26b   :  { %v2531_v54 = vadd.f32 %v2530_v11, %v2480_v9 }
 0x26c   :  { %v2532_v15 = vpop.f32.mrf.mxu1 }
 0x26d   :  { %v2533_v19 = vadd.f32 %v2532_v15, %v2482_v14 }
 0x26e   :  { %v2534_v46 = vpop.f32.mrf.mxu1 }
 0x26f   :  { %v2535_v25 = vadd.f32 %v2534_v46, %v2484_v16 }
 0x270   :  { %v2536_v27 = vpop.f32.mrf.mxu1 }
 0x271   :  { %v2537_v28 = vadd.f32 %v2536_v27, %v2486_v24 }
 0x272   :  { %v2540_v30 = vpop.f32.mrf.mxu1 }
 0x273   :  { %v2541_v37 = vadd.f32 %v2540_v30, %v2490_v26 }
 0x274   :  { %v2542_v58 = vpop.f32.mrf.mxu1 }
 0x275   :  { %v2543_v41 = vadd.f32 %v2542_v58, %v2492_v36 }
 0x276   :  { %v2544_v45 = vpop.f32.mrf.mxu1 }
 0x278   :  { %v2545_v43 = vpop.f32.mrf.mxu1 }
 0x279   :  { %v4776_v43 = vld [vmem:[%s5760_s5 + $0x170] sm:$0xff]  }
 0x281   :  { %v2581_v1 = vpop.f32.mrf.mxu0 }
 0x282   :  { %v2582_v49 = vadd.f32 %v2581_v1, %v2531_v54 }
 0x283   :  { %v2583_v51 = vpop.f32.mrf.mxu0 }
 0x284   :  { %v2584_v52 = vadd.f32 %v2583_v51, %v2533_v19 }
 0x285   :  { %v2585_v29 = vpop.f32.mrf.mxu0 }
 0x286   :  { %v2586_v53 = vadd.f32 %v2585_v29, %v2535_v25 }
 0x287   :  { %v2587_v35 = vpop.f32.mrf.mxu0 }
 0x288   :  { %v2588_v33 = vadd.f32 %v2587_v35, %v2537_v28  ;;  %v4778_v35 = vld [vmem:[%s5760_s5 + $0x168] sm:$0xff]  }
 0x289   :  { %v2591_v56 = vpop.f32.mrf.mxu0 }
 0x28a   :  { %v2592_v55 = vadd.f32 %v2591_v56, %v2541_v37  ;;  %v4780_v56 = vld [vmem:[%s5760_s5 + $0x160] sm:$0xff]  }
 0x28b   :  { %v2593_v18 = vpop.f32.mrf.mxu0 }
 0x28c   :  { %v2594_v57 = vadd.f32 %v2593_v18, %v2543_v41  ;;  %v4782_v18 = vld [vmem:[%s5760_s5 + $0x158] sm:$0xff]  }
 0x28d   :  { %v2595_v59 = vpop.f32.mrf.mxu0 }
 0x28e   :  { %v4784_v59 = vld [vmem:[%s5760_s5 + $0x150] sm:$0xff]  }
 0x28f   :  { %v2596_v60 = vpop.f32.mrf.mxu0 }
 0x290   :  { %v4785_v60 = vld [vmem:[%s5760_s5 + $0x110] sm:$0xff]  }
 0x2aa   :  { %v2632_v61 = vpop.f32.mrf.mxu1 }
 0x2ab   :  { %v2633_v32 = vadd.f32 %v2632_v61, %v2582_v49  ;;  %v4786_v61 = vld [vmem:[%s5760_s5 + $0x148] sm:$0xff]  }
 0x2ac   :  { %v2634_v38 = vpop.f32.mrf.mxu1 }
 0x2ad   :  { %v2635_v62 = vadd.f32 %v2634_v38, %v2584_v52 }
 0x2ae   :  { %v2636_v17 = vpop.f32.mrf.mxu1 }
 0x2af   :  { %v2637_v15 = vadd.f32 %v2636_v17, %v2586_v53  ;;  %v4777_v53 = vld [vmem:[%s5760_s5 + $0x130] sm:$0xff]   ;;  %v4789_v17 = vld [vmem:[%s5760_s5 + $0x100] sm:$0xff]  }
 0x2b0   :  { %v2638_v40 = vpop.f32.mrf.mxu1 }
 0x2b1   :  { %v2639_v20 = vadd.f32 %v2638_v40, %v2588_v33  ;;  %v4779_v33 = vld [vmem:[%s5760_s5 + $0x128] sm:$0xff]  }
 0x2b2   :  { %v2642_v63 = vpop.f32.mrf.mxu1 }
 0x2b3   :  { %v2643_v23 = vadd.f32 %v2642_v63, %v2592_v55  ;;  %v4781_v55 = vld [vmem:[%s5760_s5 + $0x120] sm:$0xff]  }
 0x2b4   :  { %v2644_v4 = vpop.f32.mrf.mxu1 }
 0x2b5   :  { %v2645_v28 = vadd.f32 %v2644_v4, %v2594_v57  ;;  %v4783_v57 = vld [vmem:[%s5760_s5 + $0x118] sm:$0xff]   ;;  %v4909_v4 = vmov 0.0  }
 0x2b6   :  { %v2646_v2 = vpop.f32.mrf.mxu1  ;;  %4296 = vmatprep.subr.bf16.mxu1 %v4909_v4 }
 0x2b7   :  { %v4791_v2 = vld [vmem:[%s5762_s7 + $0x30] sm:$0xff]  }
 0x2b8   :  { %v2647_v50 = vpop.f32.mrf.mxu1 }
 0x2b9   :  { %v4792_v50 = vld [vmem:[%s5762_s7 + $0x28] sm:$0xff]  }
 0x2c1   :  { %v2683_v6 = vpop.f32.mrf.mxu0 }
 0x2c2   :  { %v2684_v16 = vadd.f32 %v2683_v6, %v2633_v32  ;;  %v4787_v32 = vld [vmem:[%s5760_s5 + $0x108] sm:$0xff]   ;;  %v4793_v6 = vld [vmem:[%s5762_s7 + $0x20] sm:$0xff]  }
 0x2c3   :  { %v2685_v8 = vpop.f32.mrf.mxu0 }
 0x2c4   :  { %v2686_v46 = vadd.f32 %v2685_v8, %v2635_v62  ;;  %v4788_v62 = vld [vmem:[%s5760_s5 + $0x140] sm:$0xff]   ;;  %v4794_v8 = vld [vmem:[%s5762_s7 + $0x18] sm:$0xff]  }
 0x2c5   :  { %v2687_v9 = vpop.f32.mrf.mxu0 }
 0x2c6   :  { %v2688_v22 = vadd.f32 %v2687_v9, %v2637_v15  ;;  %v4795_v9 = vld [vmem:[%s5762_s7 + $0x10] sm:$0xff]  }
 0x2c7   :  { %v2689_v10 = vpop.f32.mrf.mxu0  ;;  %v4804_v15 = vld [vmem:[#allocation4 + $0x50] ss:$8 sps:$4 sm:$0xff]  }
 0x2c8   :  { %v2690_v25 = vadd.f32 %v2689_v10, %v2639_v20  ;;  %v4796_v10 = vld [vmem:[%s5762_s7 + $0x8] sm:$0xff]   ;;  %v4812_v20 = vld [vmem:[#allocation4 + $0x34] ss:$8 sps:$4 sm:$0xff]  }
 0x2c9   :  { %v2693_v11 = vpop.f32.mrf.mxu0 }
 0x2ca   :  { %v5666_v12 = vadd.f32 %v2693_v11, %v2643_v23  ;;  %v4790_v23 = vld [vmem:[%s5762_s7 + $0x38] sm:$0xff]   ;;  %v4797_v11 = vld [vmem:[%s5762_s7] sm:$0xff]  }
 0x2cb   :  { %v2695_v13 = vpop.f32.mrf.mxu0 }
 0x2cc   :  { %v2696_v36 = vadd.f32 %v2695_v13, %v2645_v28  ;;  %v4800_v13 = vld [vmem:[#allocation4 + $0x74] ss:$8 sps:$4 sm:$0xff]  }
 0x2cd   :  { %v2697_v14 = vpop.f32.mrf.mxu0 }
 0x2ce   :  { %v4803_v14 = vld [vmem:[#allocation4 + $0x64] ss:$8 sps:$4 sm:$0xff]  }
 0x2cf   :  { %v2698_v54 = vpop.f32.mrf.mxu0 }
 0x2d0   :  { %v4801_v54 = vld [vmem:[#allocation4 + $0x60] ss:$8 sps:$4 sm:$0xff]  }
 0x2ea   :  { %v2734_v0 = vpop.f32.mrf.mxu1 }
 0x2eb   :  { %v2735_v21 = vadd.f32 %v2734_v0, %v2684_v16  ;;  %v4806_v0 = vld [vmem:[#allocation4 + $0x54] ss:$8 sps:$4 sm:$0xff]   ;;  %v4809_v16 = vld [vmem:[#allocation4 + $0x44] ss:$8 sps:$4 sm:$0xff]  }
 0x2ec   :  { %v2736_v19 = vpop.f32.mrf.mxu1 }
 0x2ed   :  { %v2737_v5 = vadd.f32 %v2736_v19, %v2686_v46  ;;  %v2751_v31 = vmax.f32 %v2735_v21, 0.0  ;;  %v4807_v19 = vld [vmem:[#allocation4 + $0x40] ss:$8 sps:$4 sm:$0xff]   ;;  %v4810_v46 = vld [vmem:[#allocation4 + $0x30] ss:$8 sps:$4 sm:$0xff]  }
 0x2ee   :  { %v2738_v24 = vpop.f32.mrf.mxu1  ;;  %v4813_v21 = vld [vmem:[#allocation4 + $0x20] ss:$8 sps:$4 sm:$0xff]  }
 0x2ef   :  { %v2739_v27 = vadd.f32 %v2738_v24, %v2688_v22  ;;  %v2752_v37 = vmax.f32 %v2737_v5, 0.0  ;;  %v4815_v22 = vld [vmem:[#allocation4 + $0x24] ss:$8 sps:$4 sm:$0xff]   ;;  %v4818_v24 = vld [vmem:[#allocation4 + $0x14] ss:$8 sps:$4 sm:$0xff]  }
 0x2f0   :  { %v2740_v26 = vpop.f32.mrf.mxu1 }
 0x2f1   :  { %v2753_v30 = vmax.f32 %v2739_v27, 0.0  ;;  %v2741_v7 = vadd.f32 %v2740_v26, %v2690_v25  ;;  %v4816_v25 = vld [vmem:[#allocation4 + $0x10] ss:$8 sps:$4 sm:$0xff]  }
 0x2f2   :  { %v2744_v34 = vpop.f32.mrf.mxu1 }
 0x2f3   :  { %v2757_v39 = vpack.c.bf16 %v2753_v30, %v2751_v31  ;;  %v2754_v58 = vmax.f32 %v2741_v7, 0.0  ;;  %v2745_v38 = vadd.f32 %v2744_v34, %v5666_v12  ;;  %v4798_v12 = vld [vmem:[#allocation4 + $0x70] ss:$8 sps:$4 sm:$0xff]  }
 0x2f4   :  { %v2746_v41 = vpop.f32.mrf.mxu1 }
 0x2f5   :  { %v2758_v42 = vpack.c.bf16 %v2754_v58, %v2752_v37  ;;  %v2747_v45 = vadd.f32 %v2746_v41, %v2696_v36  ;;  %v2763_v51 = vrot.slane %v2757_v39, 4  ;;  %v2755_v40 = vmax.f32 %v2745_v38, 0.0  ;;  %v4016_v37 = vld [vmem:[%s5761_s6] ss:$0 sm:$0xff]  ;;  %v4832_v38 = vld [vmem:[#allocation6 + $0x50] sm:$0xff]  }
 0x2f6   :  { %v2748_v3 = vpop.f32.mrf.mxu1 }
 0x2f7   :  { %v2756_v1 = vmax.f32 %v2747_v45, 0.0  ;;  %3190 = vmatprep.mubr.bf16.mxu0 %v2758_v42  ;;  %v2764_v49 = vrot.slane %v2758_v42, 4  ;;  %v2759_v63 = vpack.c.bf16 %v2755_v40, %v2755_v40 }
 0x2f8   :  { %v2749_v52 = vpop.f32.mrf.mxu1  ;;  %3191 = vmatmul.mubr.bf16.vlgmr.msra.gmra.mxu0 %v2757_v39 }
 0x2f9   :  { %v2760_v29 = vpack.c.bf16 %v2756_v1, %v2756_v1  ;;  %4244 = vmatpush3.bf16.msra.mxu0 %v4775_v48  ;;  %3230 = vmatprep.mubr.bf16.mxu1 %v2764_v49  ;;  %v4821_v52 = vld [vmem:[#allocation4 + $0x4] ss:$8 sps:$4 sm:$0xff]  }
 0x2fa   :  { %3231 = vmatmul.mubr.bf16.vlgmr.msra.gmra.mxu1 %v2763_v51  ;;  %4245 = vmatprep.subr.bf16.mxu0 %v4776_v43 }
 0x2fb   :  { %3270 = vmatprep.mubr.bf16.mxu0 %v2760_v29  ;;  %4297 = vmatpush3.bf16.msra.mxu1 %v4790_v23  ;;  %v4819_v29 = vld [vmem:[#allocation4] ss:$8 sps:$4 sm:$0xff]  }
 0x2fc   :  { %4298 = vmatprep.subr.bf16.mxu1 %v4909_v4  ;;  %4312 = vmatprep.mubr.msk.bf16.mxu1 %vm4910_vm2, %v4909_v4 }
 0x2fd   :  { %4246 = vmatpush3.bf16.msra.mxu0 %v4777_v53  ;;  %v4911_v53 = vmov 0  }
 0x2fe   :  { %4247 = vmatprep.subr.bf16.mxu0 %v4778_v35  ;;  %v4822_v35 = vld [vmem:[#allocation6 + $0x78] sm:$0xff]  }
 0x2ff   :  { %4299 = vmatpush3.bf16.msra.mxu1 %v4791_v2 }
 0x300   :  { %4300 = vmatprep.subr.bf16.mxu1 %v4909_v4 }
 0x301   :  { %4248 = vmatpush3.bf16.msra.mxu0 %v4779_v33  ;;  %v4823_v33 = vld [vmem:[#allocation6 + $0x38] sm:$0xff]  }
 0x302   :  { %4249 = vmatprep.subr.bf16.mxu0 %v4780_v56  ;;  %v4824_v56 = vld [vmem:[#allocation6 + $0x70] sm:$0xff]  }
 0x303   :  { %4301 = vmatpush3.bf16.msra.mxu1 %v4792_v50 }
 0x304   :  { %4302 = vmatprep.subr.bf16.mxu1 %v4909_v4 }
 0x305   :  { %4250 = vmatpush3.bf16.msra.mxu0 %v4781_v55  ;;  %v4825_v55 = vld [vmem:[#allocation6 + $0x30] sm:$0xff]  }
 0x306   :  { %4251 = vmatprep.subr.bf16.mxu0 %v4782_v18  ;;  %v4826_v18 = vld [vmem:[#allocation6 + $0x68] sm:$0xff]  }
 0x307   :  { %4303 = vmatpush3.bf16.msra.mxu1 %v4793_v6 }
 0x308   :  { %4304 = vmatprep.subr.bf16.mxu1 %v4909_v4 }
 0x309   :  { %4252 = vmatpush3.bf16.msra.mxu0 %v4783_v57  ;;  %v4827_v57 = vld [vmem:[#allocation6 + $0x28] sm:$0xff]  }
 0x30a   :  { %4253 = vmatprep.subr.bf16.mxu0 %v4784_v59  ;;  %v4828_v59 = vld [vmem:[#allocation6 + $0x60] sm:$0xff]  }
 0x30b   :  { %4305 = vmatpush3.bf16.msra.mxu1 %v4794_v8  ;;  %v4834_v8 = vld [vmem:[#allocation6 + $0x48] sm:$0xff]  }
 0x30c   :  { %4306 = vmatprep.subr.bf16.mxu1 %v4909_v4 }
 0x30d   :  { %4254 = vmatpush3.bf16.msra.mxu0 %v4785_v60  ;;  %v4829_v60 = vld [vmem:[#allocation6 + $0x20] sm:$0xff]  }
 0x30e   :  { %4255 = vmatprep.subr.bf16.mxu0 %v4786_v61  ;;  %v4830_v61 = vld [vmem:[#allocation6 + $0x58] sm:$0xff]  }
 0x30f   :  { %4307 = vmatpush3.bf16.msra.mxu1 %v4795_v9  ;;  %v4835_v9 = vld [vmem:[#allocation6 + $0x8] sm:$0xff]  }
 0x310   :  { %4308 = vmatprep.subr.bf16.mxu1 %v4909_v4 }
 0x311   :  { %4256 = vmatpush3.bf16.msra.mxu0 %v4787_v32  ;;  %v4831_v32 = vld [vmem:[#allocation6 + $0x18] sm:$0xff]  }
 0x312   :  { %4257 = vmatprep.subr.bf16.mxu0 %v4788_v62  ;;  %v4833_v62 = vld [vmem:[#allocation6 + $0x10] sm:$0xff]  }
 0x313   :  { %4309 = vmatpush3.bf16.msra.mxu1 %v4796_v10  ;;  %v4836_v10 = vld [vmem:[#allocation6 + $0x40] sm:$0xff]  }
 0x314   :  { %4310 = vmatprep.subr.bf16.mxu1 %v4909_v4 }
 0x315   :  { %4258 = vmatpush3.bf16.msra.mxu0 %v4789_v17  ;;  %v4065_v17 = vld [vmem:[%s5763_s8] ss:$0 sm:$0xff] }
 0x316   :  { %3501 = vmatprep.subr.bf16.mxu0 %v4800_v13 }
 0x317   :  { %4311 = vmatpush3.bf16.msra.mxu1 %v4797_v11  ;;  %v4837_v11 = vld [vmem:[#allocation6] sm:$0xff]  }
 0x318   :  { %3271 = vmatmul.mubr.bf16.vlgmr.msra.gmra.mxu0 %v2759_v63  ;;  %4274 = vmatprep.subr.bf16.mxu1 %v4822_v35 }
 0x319   :  { %3502 = vmatpush1.bf16.msra.mxu0 %v4798_v12  ;;  %3533 = vmatprep.mubr.bf16.mxu0 %v4911_v53  ;;  %v3409_v12 = vld [vmem:[%s5765_s10] sm:$0x3] }
 0x31a   :  { %3503 = vmatprep.subr.bf16.mxu0 %v4803_v14  ;;  %v3414_v13 = vrot.slane %v3409_v12, %v5430_v47  ;;  %v3418_v14 = vrot.slane %v3409_v12, %v5433_v44 }
 0x31d   :  { %3504 = vmatpush1.bf16.msra.mxu0 %v4801_v54 }
 0x31e   :  { %3505 = vmatprep.subr.bf16.mxu0 %v4806_v0 }
 0x321   :  { %3506 = vmatpush1.bf16.msra.mxu0 %v4804_v15 }
 0x322   :  { %3507 = vmatprep.subr.bf16.mxu0 %v4809_v16 }
 0x325   :  { %3508 = vmatpush1.bf16.msra.mxu0 %v4807_v19 }
 0x326   :  { %3509 = vmatprep.subr.bf16.mxu0 %v4812_v20 }
 0x329   :  { %3510 = vmatpush1.bf16.msra.mxu0 %v4810_v46 }
 0x32a   :  { %3511 = vmatprep.subr.bf16.mxu0 %v4815_v22 }
 0x32d   :  { %3512 = vmatpush1.bf16.msra.mxu0 %v4813_v21 }
 0x32e   :  { %3513 = vmatprep.subr.bf16.mxu0 %v4818_v24 }
 0x331   :  { %3514 = vmatpush1.bf16.msra.mxu0 %v4816_v25 }
 0x332   :  { %3515 = vmatprep.subr.bf16.mxu0 %v4821_v52 }
 0x335   :  { %3516 = vmatpush1.bf16.msra.mxu0 %v4819_v29 }
 0x3b8   :  { %v4215_v5 = vpop.f32.mrf.mxu0 }
 0x3ba   :  { %v4216_v27 = vpop.f32.mrf.mxu0  ;;  %v4237_v26 = vpop.f32.mrf.mxu1 }
 0x3bb   :  { %v4217_v36 = vadd.f32 %v4216_v27, %v4215_v5  ;;  %v4090_v5 = vld [vmem:[%s5767_s12] ss:$0 sm:$0xff] }
 0x3bc   :  { %v4218_v28 = vpop.f32.mrf.mxu0  ;;  %v4238_v31 = vpop.f32.mrf.mxu1 }
 0x3bd   :  { %v3193_v39 = vadd.f32 %v4217_v36, %v4016_v37  ;;  %v4239_v58 = vadd.f32 %v4238_v31, %v4237_v26 }
 0x3be   :  { %v4219_v30 = vpop.f32.mrf.mxu0  ;;  %v4240_v7 = vpop.f32.mrf.mxu1 }
 0x3bf   :  { %v3233_v45 = vadd.f32 %v4239_v58, %v3193_v39 }
 0x3c0   :  { %v4241_v34 = vpop.f32.mrf.mxu1 }
 0x3d8   :  { %v4259_v41 = vpop.f32.mrf.mxu0 }
 0x3da   :  { %v4260_v42 = vpop.f32.mrf.mxu0 }
 0x3db   :  { %v4261_v48 = vadd.f32 %v4260_v42, %v4259_v41 }
 0x3dc   :  { %v4262_v3 = vpop.f32.mrf.mxu0 }
 0x3dd   :  { %v3273_v43 = vadd.f32 %v4261_v48, %v3233_v45 }
 0x3de   :  { %v4263_v1 = vpop.f32.mrf.mxu0 }
 0x3df   :  { %v3278_v49 = vmax.f32 %v3273_v43, 0.0 }
 0x3e1   :  { %v3279_v51 = vpack.c.bf16 %v3278_v49, %v3278_v49 }
 0x3e3   :  { %4313 = vmatmul.mubr.bf16.vlgmr.msra.gmra.mxu1 %v3279_v51 }
 0x3e4   :  { %4275 = vmatpush3.bf16.msra.mxu1 %v4823_v33 }
 0x3e5   :  { %4276 = vmatprep.subr.bf16.mxu1 %v4824_v56 }
 0x3e8   :  { %4277 = vmatpush3.bf16.msra.mxu1 %v4825_v55 }
 0x3e9   :  { %4278 = vmatprep.subr.bf16.mxu1 %v4826_v18 }
 0x3ec   :  { %4279 = vmatpush3.bf16.msra.mxu1 %v4827_v57 }
 0x3ed   :  { %4280 = vmatprep.subr.bf16.mxu1 %v4828_v59 }
 0x3f0   :  { %4281 = vmatpush3.bf16.msra.mxu1 %v4829_v60 }
 0x3f1   :  { %4282 = vmatprep.subr.bf16.mxu1 %v4830_v61 }
 0x3f4   :  { %4283 = vmatpush3.bf16.msra.mxu1 %v4831_v32 }
 0x3f5   :  { %4284 = vmatprep.subr.bf16.mxu1 %v4832_v38 }
 0x3f8   :  { %4285 = vmatpush3.bf16.msra.mxu1 %v4833_v62 }
 0x3f9   :  { %4286 = vmatprep.subr.bf16.mxu1 %v4834_v8 }
 0x3fc   :  { %4287 = vmatpush3.bf16.msra.mxu1 %v4835_v9 }
 0x3fd   :  { %4288 = vmatprep.subr.bf16.mxu1 %v4836_v10 }
 0x400   :  { %4289 = vmatpush3.bf16.msra.mxu1 %v4837_v11 }
 0x4a3   :  { %v3385_v40 = vpop.f32.mrf.mxu1 }
 0x4a4   :  { %v3386_v63 = vadd.f32 %v4065_v17, %v3385_v40 }
 0x4a5   :  { %v4314_v23 = vpop.f32.mrf.mxu1 }
 0x4a6   :  { %v3391_v4 = vmax.f32 %v3386_v63, 0.0 }
 0x4a7   :  { %v3388_v2 = vpop.f32.mrf.mxu1 }
 0x4a8   :  { %v3392_v50 = vpack.c.bf16 %v3391_v4, %v3391_v4 }
 0x4a9   :  { %v4315_v6 = vpop.f32.mrf.mxu1 }
 0x4aa   :  { %3534 = vmatmul.mubr.bf16.vlgmr.msra.gmra.mxu0 %v3392_v50 }
 0x56a   :  { %v3535_v54 = vpop.f32.mrf.mxu0 }
 0x56b   :  { %v3536_v0 = vadd.f32 %v3535_v54, %v3414_v13 }
 0x56c   :  { %v3537_v15 = vpop.f32.mrf.mxu0 }
 0x56d   :  { %v3538_v16 = vadd.f32 %v3537_v15, %v3418_v14  ;;  %v3542_v19 = vmax.f32 %v3536_v0, 0.0 }
 0x56e   :  { %v3539_v20 = vpop.f32.mrf.mxu0 }
 0x56f   :  { %v3543_v46 = vmax.f32 %v3538_v16, 0.0  ;;  %v3544_v24 = vpack.c.bf16 %v3542_v19, %v3542_v19 }
 0x570   :  { %v3540_v22 = vpop.f32.mrf.mxu0 }
 0x571   :  { %v3545_v21 = vpack.c.bf16 %v3543_v46, %v3543_v46 }
 0x573   :  { %3713 = vmatprep.mubr.bf16.mxu1 %v3545_v21 }
 0x574   :  { %3714 = vmatmul.mubr.bf16.vlgmr.msra.gmra.mxu1 %v3544_v24 }
 0x634   :  { %v4290_v25 = vpop.f32.mrf.mxu1 }
 0x636   :  { %v4291_v47 = vpop.f32.mrf.mxu1 }
 0x637   :  { %v4292_v27 = vadd.f32 %v4291_v47, %v4290_v25 }
 0x638   :  { %v4293_v44 = vpop.f32.mrf.mxu1 }
 0x639   :  { %v3716_v26 = vadd.f32 %v4292_v27, %v4090_v5 }
 0x63a   :  { %v4294_v28 = vpop.f32.mrf.mxu1 }
 0x63b   :  { %3721 = vst [vmem:[%s5768_s13] sm:$0xff] %v3716_v26 }
 0x63c   :  { %3726 = vsyncpa [#allocation3], 1 }
 0x63d   :  { %3727 = vsyncpa [#allocation5], 1 }

</bundles_post_ra>
